<compile_context>
chip_gen: v7x
topology: tpu7x:2x2x1
jax: 0.10.0
libtpu: 0.0.40
codegen_flags: <defaults>
</compile_context>

<pallas_src>
import functools
import math

import jax
import jax.numpy as jnp
from jax.experimental import pallas as pl
from jax.experimental.pallas import tpu as pltpu


# ---------------------------------------------------------------------------
# Fused forward kernel
#   encoder -> reparam + KL -> z/u split + grouper -> rnn step -> decoder + BCE
# ---------------------------------------------------------------------------
def _fused_forward_kernel(
    # inputs
    x_ref, xdec_ref, h_tm1_ref, eps_ref,
    ew1_ref, eb1_ref, ew2_ref, eb2_ref,
    rwhh_ref, rwsh_ref, rb_ref,
    dw1_ref, db1_ref, dw2_ref, db2_ref,
    # outputs
    s_ref, h_ref, probs_ref, kl_ref, nll_ref,
    *, n_caps, cap_dim, grp_eps):
    f32 = jnp.float32

    # ---- encoder: linear+ReLU, linear -> [mu | logvar] ----------------------
    x = x_ref[...]
    h1 = jnp.dot(x, ew1_ref[...], preferred_element_type=f32) + eb1_ref[...]
    h1 = jnp.maximum(h1, 0.0)
    head = jnp.dot(h1, ew2_ref[...], preferred_element_type=f32) + eb2_ref[...]

    zdim = eps_ref.shape[1]
    mu = head[:, :zdim]
    logvar = head[:, zdim:]
    std = jnp.exp(0.5 * logvar)            # EUP
    var = std * std                        # reuse exp instead of exp(logvar)
    z_t = mu + std * eps_ref[...]
    kl_ref[...] = 0.5 * (mu * mu + var - logvar - 1.0)

    # ---- z/u split (in-kernel, lane-aligned view) + capsule grouper ---------
    half = zdim // 2
    z = z_t[:, :half]
    u = z_t[:, half:]
    b = z.shape[0]
    u2 = (u * u).reshape(b, n_caps, cap_dim)
    denom = jnp.sum(u2, axis=-1, keepdims=True)                 # (b, n_caps, 1)
    denom = jnp.broadcast_to(denom, (b, n_caps, cap_dim)).reshape(b, half)
    s = z * jax.lax.rsqrt(denom + grp_eps)
    s_ref[...] = s

    # ---- rnn: h_t = tanh(h_{t-1} W_hh + s W_sh + b) -------------------------
    pre = jnp.dot(h_tm1_ref[...], rwhh_ref[...], preferred_element_type=f32)
    pre = pre + jnp.dot(s, rwsh_ref[...], preferred_element_type=f32)
    pre = pre + rb_ref[...]
    h_t = jnp.tanh(pre)
    h_ref[...] = h_t

    # ---- decoder (rnn.preprocess_for_decoder == identity) -------------------
    h2 = jnp.dot(h_t, dw1_ref[...], preferred_element_type=f32) + db1_ref[...]
    h2 = jnp.maximum(h2, 0.0)
    logits = jnp.dot(h2, dw2_ref[...], preferred_element_type=f32) + db2_ref[...]

    xd = xdec_ref[...]
    e = jnp.exp(-jnp.abs(logits))                               # single EUP exp
    inv = pl.reciprocal(1.0 + e, approx=True)
    probs_ref[...] = jnp.where(logits >= 0.0, inv, e * inv)     # stable sigmoid
    nll_ref[...] = jnp.maximum(logits, 0.0) - logits * xd + jnp.log1p(e)


# ---------------------------------------------------------------------------
# Parameters
# ---------------------------------------------------------------------------
def init_params(key, x_dim, enc_hidden, z_total, rnn_hidden, dec_hidden,
                n_caps, cap_dim):
    half = n_caps * cap_dim
    assert z_total == 2 * half           # half -> z, half -> u
    ks = jax.random.split(key, 6)

    def w(k, shape, scale=0.05):
        return (scale * jax.random.normal(k, shape)).astype(jnp.float32)

    return {
        # encoder
        "enc_w1": w(ks[0], (x_dim, enc_hidden)),
        "enc_b1": jnp.zeros((1, enc_hidden), jnp.float32),
        "enc_w2": w(ks[1], (enc_hidden, 2 * z_total)),
        "enc_b2": jnp.zeros((1, 2 * z_total), jnp.float32),
        # rnn
        "rnn_whh": w(ks[2], (rnn_hidden, rnn_hidden)),
        "rnn_wsh": w(ks[3], (half, rnn_hidden)),
        "rnn_b": jnp.zeros((1, rnn_hidden), jnp.float32),
        # decoder
        "dec_w1": w(ks[4], (rnn_hidden, dec_hidden)),
        "dec_b1": jnp.zeros((1, dec_hidden), jnp.float32),
        "dec_w2": w(ks[5], (dec_hidden, x_dim)),
        "dec_b2": jnp.zeros((1, x_dim), jnp.float32),
    }


# ---------------------------------------------------------------------------
# forward(): mirrors Topographic_Autoregressive_NoConcat.forward
#   returns (s, None, h_t, probs_x, kl_z, neg_log_px_z)
# ---------------------------------------------------------------------------
def forward(params, x_t, h_tm1, eps, x_tp1=None, steps_ahead=1, *,
            n_caps, cap_dim, grp_eps=1e-6):
    B, C, H, W = x_t.shape
    D = C * H * W
    x_flat = x_t.reshape(B, D).astype(jnp.float32)
    x_dec = x_tp1 if (x_tp1 is not None and steps_ahead > 0) else x_t
    x_dec_flat = x_dec.reshape(B, D).astype(jnp.float32)

    z_total = eps.shape[1]
    half = z_total // 2
    assert half == n_caps * cap_dim
    rnn_hidden = h_tm1.shape[1]
    enc_hidden = params["enc_w1"].shape[1]
    dec_hidden = params["dec_w1"].shape[1]

    ins = (x_flat, x_dec_flat,
           h_tm1.astype(jnp.float32), eps.astype(jnp.float32),
           params["enc_w1"], params["enc_b1"], params["enc_w2"], params["enc_b2"],
           params["rnn_whh"], params["rnn_wsh"], params["rnn_b"],
           params["dec_w1"], params["dec_b1"], params["dec_w2"], params["dec_b2"])

    out_shape = (
        jax.ShapeDtypeStruct((B, half), jnp.float32),        # s
        jax.ShapeDtypeStruct((B, rnn_hidden), jnp.float32),  # h_t
        jax.ShapeDtypeStruct((B, D), jnp.float32),           # probs_x (flat)
        jax.ShapeDtypeStruct((B, z_total), jnp.float32),     # kl_z (per element)
        jax.ShapeDtypeStruct((B, D), jnp.float32),           # neg_log_px_z (flat)
    )

    # Advisory cost estimate so XLA schedules surrounding ops around the call.
    flops = 2 * B * (D * enc_hidden + enc_hidden * 2 * z_total
                     + rnn_hidden * rnn_hidden + half * rnn_hidden
                     + rnn_hidden * dec_hidden + dec_hidden * D)
    transcendentals = B * (z_total + half + rnn_hidden + 2 * D)
    bytes_accessed = 4 * (sum(int(a.size) for a in ins)
                          + sum(math.prod(o.shape) for o in out_shape))

    vmem = pl.BlockSpec(memory_space=pltpu.MemorySpace.VMEM)
    kernel = functools.partial(_fused_forward_kernel,
                               n_caps=n_caps, cap_dim=cap_dim, grp_eps=grp_eps)

    s, h_t, probs_flat, kl_z, nll_flat = pl.pallas_call(
        kernel,
        out_shape=out_shape,
        in_specs=[vmem] * len(ins),
        out_specs=tuple([vmem] * len(out_shape)),
        cost_estimate=pl.CostEstimate(flops=flops,
                                      transcendentals=transcendentals,
                                      bytes_accessed=bytes_accessed),
    )(*ins)

    probs_x = probs_flat.reshape(B, C, H, W)
    neg_log_px_z = nll_flat.reshape(B, C, H, W)
    # TODO(synk): encoder's log_q_z / log_p_z are not returned by forward(); omitted.
    return (s, None, h_t, probs_x, kl_z, neg_log_px_z)


# ---------------------------------------------------------------------------
if __name__ == "__main__":
    # Small shapes consistent with the module's forward; all feature widths are
    # multiples of 128 so every matmul / store is lane-dense.
    B, C, H, W = 8, 1, 16, 16
    X_DIM = C * H * W                 # 256
    N_CAPS, CAP_DIM = 16, 8
    HALF = N_CAPS * CAP_DIM           # 128 (grouper / s width)
    Z_TOTAL = 2 * HALF                # 256 (z | u)
    ENC_HIDDEN = 256
    RNN_HIDDEN = 128
    DEC_HIDDEN = 256

    key = jax.random.PRNGKey(0)
    k_par, k_x, k_xp1, k_eps = jax.random.split(key, 4)

    params = init_params(k_par, X_DIM, ENC_HIDDEN, Z_TOTAL, RNN_HIDDEN,
                         DEC_HIDDEN, N_CAPS, CAP_DIM)

    x_t = jax.random.uniform(k_x, (B, C, H, W), dtype=jnp.float32)
    x_tp1 = jax.random.uniform(k_xp1, (B, C, H, W), dtype=jnp.float32)
    h_tm1 = jnp.zeros((B, RNN_HIDDEN), jnp.float32)
    eps = jax.random.normal(k_eps, (B, Z_TOTAL), dtype=jnp.float32)

    s, _none, h_t, probs_x, kl_z, neg_log_px_z = forward(
        params, x_t, h_tm1, eps, x_tp1=x_tp1, steps_ahead=1,
        n_caps=N_CAPS, cap_dim=CAP_DIM)

    for arr in (s, h_t, probs_x, kl_z, neg_log_px_z):
        jax.block_until_ready(arr)

    assert s.shape == (B, HALF)
    assert h_t.shape == (B, RNN_HIDDEN)
    assert probs_x.shape == (B, C, H, W)
    assert kl_z.shape == (B, Z_TOTAL)
    assert neg_log_px_z.shape == (B, C, H, W)
    assert bool(jnp.all(jnp.isfinite(probs_x)))
    assert bool(jnp.all(jnp.isfinite(neg_log_px_z)))

    print("KERNEL_OK")
</pallas_src>

<mosaic_0001>
module attributes {stable_mosaic.version = 11 : i64} {
  func.func @_fused_forward_kernel(%arg0: memref<8x256xf32, #tpu.memory_space<vmem>>, %arg1: memref<8x256xf32, #tpu.memory_space<vmem>>, %arg2: memref<8x128xf32, #tpu.memory_space<vmem>>, %arg3: memref<8x256xf32, #tpu.memory_space<vmem>>, %arg4: memref<256x256xf32, #tpu.memory_space<vmem>>, %arg5: memref<1x256xf32, #tpu.memory_space<vmem>>, %arg6: memref<256x512xf32, #tpu.memory_space<vmem>>, %arg7: memref<1x512xf32, #tpu.memory_space<vmem>>, %arg8: memref<128x128xf32, #tpu.memory_space<vmem>>, %arg9: memref<128x128xf32, #tpu.memory_space<vmem>>, %arg10: memref<1x128xf32, #tpu.memory_space<vmem>>, %arg11: memref<128x256xf32, #tpu.memory_space<vmem>>, %arg12: memref<1x256xf32, #tpu.memory_space<vmem>>, %arg13: memref<256x256xf32, #tpu.memory_space<vmem>>, %arg14: memref<1x256xf32, #tpu.memory_space<vmem>>, %arg15: memref<8x128xf32, #tpu.memory_space<vmem>>, %arg16: memref<8x128xf32, #tpu.memory_space<vmem>>, %arg17: memref<8x256xf32, #tpu.memory_space<vmem>>, %arg18: memref<8x256xf32, #tpu.memory_space<vmem>>, %arg19: memref<8x256xf32, #tpu.memory_space<vmem>>) attributes {dimension_semantics = [], scalar_prefetch = 0 : i64, scratch_operands = 0 : i64, tpu.core_type = #tpu.core_type<tc>} {
    %c0 = arith.constant 0 : index
    %c0_0 = arith.constant 0 : index
    %0 = vector.load %arg0[%c0, %c0_0] : memref<8x256xf32, #tpu.memory_space<vmem>>, vector<8x256xf32>
    %c0_1 = arith.constant 0 : index
    %c0_2 = arith.constant 0 : index
    %1 = vector.load %arg4[%c0_1, %c0_2] : memref<256x256xf32, #tpu.memory_space<vmem>>, vector<256x256xf32>
    %cst = arith.constant dense<0.000000e+00> : vector<8x256xf32>
    %2 = tpu.matmul %0, %1, %cst {dimension_numbers = #tpu.dot_dimension_numbers<[1], [0], [0], [1], [0, 0, 1, 1], [], []>} : vector<8x256xf32>, vector<256x256xf32>, vector<8x256xf32> -> vector<8x256xf32>
    %c0_3 = arith.constant 0 : index
    %c0_4 = arith.constant 0 : index
    %3 = vector.load %arg5[%c0_3, %c0_4] : memref<1x256xf32, #tpu.memory_space<vmem>>, vector<1x256xf32>
    %4 = vector.broadcast %3 : vector<1x256xf32> to vector<8x256xf32>
    %5 = arith.addf %2, %4 : vector<8x256xf32>
    %cst_5 = arith.constant 0.000000e+00 : f32
    %6 = vector.broadcast %cst_5 : f32 to vector<8x256xf32>
    %7 = arith.maximumf %5, %6 : vector<8x256xf32>
    %c0_6 = arith.constant 0 : index
    %c0_7 = arith.constant 0 : index
    %8 = vector.load %arg6[%c0_6, %c0_7] : memref<256x512xf32, #tpu.memory_space<vmem>>, vector<256x512xf32>
    %cst_8 = arith.constant dense<0.000000e+00> : vector<8x512xf32>
    %9 = tpu.matmul %7, %8, %cst_8 {dimension_numbers = #tpu.dot_dimension_numbers<[1], [0], [0], [1], [0, 0, 1, 1], [], []>} : vector<8x256xf32>, vector<256x512xf32>, vector<8x512xf32> -> vector<8x512xf32>
    %c0_9 = arith.constant 0 : index
    %c0_10 = arith.constant 0 : index
    %10 = vector.load %arg7[%c0_9, %c0_10] : memref<1x512xf32, #tpu.memory_space<vmem>>, vector<1x512xf32>
    %11 = vector.broadcast %10 : vector<1x512xf32> to vector<8x512xf32>
    %12 = arith.addf %9, %11 : vector<8x512xf32>
    %13 = vector.extract_strided_slice %12 {offsets = [0, 0], sizes = [8, 256], strides = [1, 1]} : vector<8x512xf32> to vector<8x256xf32>
    %14 = vector.extract_strided_slice %12 {offsets = [0, 256], sizes = [8, 256], strides = [1, 1]} : vector<8x512xf32> to vector<8x256xf32>
    %cst_11 = arith.constant 5.000000e-01 : f32
    %15 = vector.broadcast %cst_11 : f32 to vector<8x256xf32>
    %16 = arith.mulf %15, %14 : vector<8x256xf32>
    %17 = math.exp %16 : vector<8x256xf32>
    %18 = arith.mulf %17, %17 : vector<8x256xf32>
    %c0_12 = arith.constant 0 : index
    %c0_13 = arith.constant 0 : index
    %19 = vector.load %arg3[%c0_12, %c0_13] : memref<8x256xf32, #tpu.memory_space<vmem>>, vector<8x256xf32>
    %20 = arith.mulf %17, %19 : vector<8x256xf32>
    %21 = arith.addf %13, %20 : vector<8x256xf32>
    %22 = arith.mulf %13, %13 : vector<8x256xf32>
    %23 = arith.addf %22, %18 : vector<8x256xf32>
    %24 = arith.subf %23, %14 : vector<8x256xf32>
    %cst_14 = arith.constant 1.000000e+00 : f32
    %25 = vector.broadcast %cst_14 : f32 to vector<8x256xf32>
    %26 = arith.subf %24, %25 : vector<8x256xf32>
    %cst_15 = arith.constant 5.000000e-01 : f32
    %27 = vector.broadcast %cst_15 : f32 to vector<8x256xf32>
    %28 = arith.mulf %27, %26 : vector<8x256xf32>
    %c0_16 = arith.constant 0 : index
    %c0_17 = arith.constant 0 : index
    %29 = vector.load %arg18[%c0_16, %c0_17] : memref<8x256xf32, #tpu.memory_space<vmem>>, vector<8x256xf32>
    tpu.vector_store %arg18[%c0_16, %c0_17], %28 {strides = array<i32>} : memref<8x256xf32, #tpu.memory_space<vmem>>, vector<8x256xf32>,
    %30 = vector.extract_strided_slice %21 {offsets = [0, 0], sizes = [8, 128], strides = [1, 1]} : vector<8x256xf32> to vector<8x128xf32>
    %31 = vector.extract_strided_slice %21 {offsets = [0, 128], sizes = [8, 128], strides = [1, 1]} : vector<8x256xf32> to vector<8x128xf32>
    %32 = arith.mulf %31, %31 : vector<8x128xf32>
    %33 = vector.shape_cast %32 : vector<8x128xf32> to vector<8x16x8xf32>
    %cst_18 = arith.constant dense<0.000000e+00> : vector<8x16xf32>
    %34 = vector.multi_reduction <add>, %33, %cst_18 [2] : vector<8x16x8xf32> to vector<8x16xf32>
    %35 = vector.shape_cast %34 : vector<8x16xf32> to vector<8x16x1xf32>
    %36 = vector.shape_cast %35 : vector<8x16x1xf32> to vector<8x16x1xf32>
    %37 = vector.broadcast %36 : vector<8x16x1xf32> to vector<8x16x8xf32>
    %38 = vector.shape_cast %37 : vector<8x16x8xf32> to vector<8x128xf32>
    %cst_19 = arith.constant 9.99999997E-7 : f32
    %39 = vector.broadcast %cst_19 : f32 to vector<8x128xf32>
    %40 = arith.addf %38, %39 : vector<8x128xf32>
    %41 = math.rsqrt %40 : vector<8x128xf32>
    %42 = arith.mulf %30, %41 : vector<8x128xf32>
    %c0_20 = arith.constant 0 : index
    %c0_21 = arith.constant 0 : index
    %43 = vector.load %arg15[%c0_20, %c0_21] : memref<8x128xf32, #tpu.memory_space<vmem>>, vector<8x128xf32>
    tpu.vector_store %arg15[%c0_20, %c0_21], %42 {strides = array<i32>} : memref<8x128xf32, #tpu.memory_space<vmem>>, vector<8x128xf32>,
    %c0_22 = arith.constant 0 : index
    %c0_23 = arith.constant 0 : index
    %44 = vector.load %arg2[%c0_22, %c0_23] : memref<8x128xf32, #tpu.memory_space<vmem>>, vector<8x128xf32>
    %c0_24 = arith.constant 0 : index
    %c0_25 = arith.constant 0 : index
    %45 = vector.load %arg8[%c0_24, %c0_25] : memref<128x128xf32, #tpu.memory_space<vmem>>, vector<128x128xf32>
    %cst_26 = arith.constant dense<0.000000e+00> : vector<8x128xf32>
    %46 = tpu.matmul %44, %45, %cst_26 {dimension_numbers = #tpu.dot_dimension_numbers<[1], [0], [0], [1], [0, 0, 1, 1], [], []>} : vector<8x128xf32>, vector<128x128xf32>, vector<8x128xf32> -> vector<8x128xf32>
    %c0_27 = arith.constant 0 : index
    %c0_28 = arith.constant 0 : index
    %47 = vector.load %arg9[%c0_27, %c0_28] : memref<128x128xf32, #tpu.memory_space<vmem>>, vector<128x128xf32>
    %cst_29 = arith.constant dense<0.000000e+00> : vector<8x128xf32>
    %48 = tpu.matmul %42, %47, %cst_29 {dimension_numbers = #tpu.dot_dimension_numbers<[1], [0], [0], [1], [0, 0, 1, 1], [], []>} : vector<8x128xf32>, vector<128x128xf32>, vector<8x128xf32> -> vector<8x128xf32>
    %49 = arith.addf %46, %48 : vector<8x128xf32>
    %c0_30 = arith.constant 0 : index
    %c0_31 = arith.constant 0 : index
    %50 = vector.load %arg10[%c0_30, %c0_31] : memref<1x128xf32, #tpu.memory_space<vmem>>, vector<1x128xf32>
    %51 = vector.broadcast %50 : vector<1x128xf32> to vector<8x128xf32>
    %52 = arith.addf %49, %51 : vector<8x128xf32>
    %53 = math.tanh %52 : vector<8x128xf32>
    %c0_32 = arith.constant 0 : index
    %c0_33 = arith.constant 0 : index
    %54 = vector.load %arg16[%c0_32, %c0_33] : memref<8x128xf32, #tpu.memory_space<vmem>>, vector<8x128xf32>
    tpu.vector_store %arg16[%c0_32, %c0_33], %53 {strides = array<i32>} : memref<8x128xf32, #tpu.memory_space<vmem>>, vector<8x128xf32>,
    %c0_34 = arith.constant 0 : index
    %c0_35 = arith.constant 0 : index
    %55 = vector.load %arg11[%c0_34, %c0_35] : memref<128x256xf32, #tpu.memory_space<vmem>>, vector<128x256xf32>
    %cst_36 = arith.constant dense<0.000000e+00> : vector<8x256xf32>
    %56 = tpu.matmul %53, %55, %cst_36 {dimension_numbers = #tpu.dot_dimension_numbers<[1], [0], [0], [1], [0, 0, 1, 1], [], []>} : vector<8x128xf32>, vector<128x256xf32>, vector<8x256xf32> -> vector<8x256xf32>
    %c0_37 = arith.constant 0 : index
    %c0_38 = arith.constant 0 : index
    %57 = vector.load %arg12[%c0_37, %c0_38] : memref<1x256xf32, #tpu.memory_space<vmem>>, vector<1x256xf32>
    %58 = vector.broadcast %57 : vector<1x256xf32> to vector<8x256xf32>
    %59 = arith.addf %56, %58 : vector<8x256xf32>
    %cst_39 = arith.constant 0.000000e+00 : f32
    %60 = vector.broadcast %cst_39 : f32 to vector<8x256xf32>
    %61 = arith.maximumf %59, %60 : vector<8x256xf32>
    %c0_40 = arith.constant 0 : index
    %c0_41 = arith.constant 0 : index
    %62 = vector.load %arg13[%c0_40, %c0_41] : memref<256x256xf32, #tpu.memory_space<vmem>>, vector<256x256xf32>
    %cst_42 = arith.constant dense<0.000000e+00> : vector<8x256xf32>
    %63 = tpu.matmul %61, %62, %cst_42 {dimension_numbers = #tpu.dot_dimension_numbers<[1], [0], [0], [1], [0, 0, 1, 1], [], []>} : vector<8x256xf32>, vector<256x256xf32>, vector<8x256xf32> -> vector<8x256xf32>
    %c0_43 = arith.constant 0 : index
    %c0_44 = arith.constant 0 : index
    %64 = vector.load %arg14[%c0_43, %c0_44] : memref<1x256xf32, #tpu.memory_space<vmem>>, vector<1x256xf32>
    %65 = vector.broadcast %64 : vector<1x256xf32> to vector<8x256xf32>
    %66 = arith.addf %63, %65 : vector<8x256xf32>
    %c0_45 = arith.constant 0 : index
    %c0_46 = arith.constant 0 : index
    %67 = vector.load %arg1[%c0_45, %c0_46] : memref<8x256xf32, #tpu.memory_space<vmem>>, vector<8x256xf32>
    %68 = math.absf %66 : vector<8x256xf32>
    %cst_47 = arith.constant 0.000000e+00 : f32
    %69 = vector.broadcast %cst_47 : f32 to vector<8x256xf32>
    %70 = arith.subf %69, %68 : vector<8x256xf32>
    %71 = math.exp %70 : vector<8x256xf32>
    %cst_48 = arith.constant 1.000000e+00 : f32
    %72 = vector.broadcast %cst_48 : f32 to vector<8x256xf32>
    %73 = arith.addf %72, %71 : vector<8x256xf32>
    %74 = tpu.reciprocal %73 {approx = true} : vector<8x256xf32> -> vector<8x256xf32>
    %cst_49 = arith.constant 0.000000e+00 : f32
    %75 = vector.broadcast %cst_49 : f32 to vector<8x256xf32>
    %76 = arith.cmpf oge, %66, %75 : vector<8x256xf32>
    %77 = arith.mulf %71, %74 : vector<8x256xf32>
    %78 = arith.select %76, %74, %77 : vector<8x256xi1>, vector<8x256xf32>
    %c0_50 = arith.constant 0 : index
    %c0_51 = arith.constant 0 : index
    %79 = vector.load %arg17[%c0_50, %c0_51] : memref<8x256xf32, #tpu.memory_space<vmem>>, vector<8x256xf32>
    tpu.vector_store %arg17[%c0_50, %c0_51], %78 {strides = array<i32>} : memref<8x256xf32, #tpu.memory_space<vmem>>, vector<8x256xf32>,
    %cst_52 = arith.constant 0.000000e+00 : f32
    %80 = vector.broadcast %cst_52 : f32 to vector<8x256xf32>
    %81 = arith.maximumf %66, %80 : vector<8x256xf32>
    %82 = arith.mulf %66, %67 : vector<8x256xf32>
    %83 = arith.subf %81, %82 : vector<8x256xf32>
    %84 = math.log1p %71 : vector<8x256xf32>
    %85 = arith.addf %83, %84 : vector<8x256xf32>
    %c0_53 = arith.constant 0 : index
    %c0_54 = arith.constant 0 : index
    %86 = vector.load %arg19[%c0_53, %c0_54] : memref<8x256xf32, #tpu.memory_space<vmem>>, vector<8x256xf32>
    tpu.vector_store %arg19[%c0_53, %c0_54], %85 {strides = array<i32>} : memref<8x256xf32, #tpu.memory_space<vmem>>, vector<8x256xf32>,
    return
  }
}

</mosaic_0001>

<bundles_post_ra>
// kernel: tpu_custom_call.1
= control target key start
LH: loop header
LB: loop body
LE: loop exit
PB: predicated region body
PF: predicated region fallthrough
CT: control target
= control target key end

     0   :  { %s3378_s0 = inlined_call_operand.hbm [shape: f32[8,256], index: 0, kind: input, shape index: {}]   ;;  %s3379_s1 = inlined_call_operand.hbm [shape: f32[8,256], index: 1, kind: input, shape index: {}]   ;;  %s3380_s2 = inlined_call_operand.hbm [shape: f32[8,128], index: 2, kind: input, shape index: {}]   ;;  %s3381_s3 = inlined_call_operand.hbm [shape: f32[8,256], index: 3, kind: input, shape index: {}]   ;;  %s3382_s4 = inlined_call_operand.hbm [shape: f32[256,256], index: 4, kind: input, shape index: {}]   ;;  %s3383_s5 = inlined_call_operand.vmem [shape: f32[1,256], index: 5, kind: input, shape index: {}]   ;;  %s3384_s6 = inlined_call_operand.hbm [shape: f32[256,512], index: 6, kind: input, shape index: {}]   ;;  %s3385_s7 = inlined_call_operand.vmem [shape: f32[1,512], index: 7, kind: input, shape index: {}]   ;;  %s3386_s8 = inlined_call_operand.hbm [shape: f32[128,128], index: 8, kind: input, shape index: {}]   ;;  %s3387_s9 = inlined_call_operand.hbm [shape: f32[128,128], index: 9, kind: input, shape index: {}]   ;;  %s3388_s10 = inlined_call_operand.vmem [shape: f32[1,128], index: 10, kind: input, shape index: {}]   ;;  %s3389_s11 = inlined_call_operand.hbm [shape: f32[128,256], index: 11, kind: input, shape index: {}]   ;;  %s3390_s12 = inlined_call_operand.vmem [shape: f32[1,256], index: 12, kind: input, shape index: {}]   ;;  %s3391_s13 = inlined_call_operand.hbm [shape: f32[256,256], index: 13, kind: input, shape index: {}]   ;;  %s3392_s14 = inlined_call_operand.vmem [shape: f32[1,256], index: 14, kind: input, shape index: {}]   ;;  %s3393_s15 = inlined_call_operand.hbm [shape: f32[8,128], index: 15, kind: output, shape index: {0}]   ;;  %s3394_s16 = inlined_call_operand.hbm [shape: f32[8,128], index: 16, kind: output, shape index: {1}]   ;;  %s3395_s17 = inlined_call_operand.hbm [shape: f32[8,256], index: 17, kind: output, shape index: {2}]   ;;  %s3396_s18 = inlined_call_operand.hbm [shape: f32[8,256], index: 18, kind: output, shape index: {3}]   ;;  %s3397_s19 = inlined_call_operand.hbm [shape: f32[8,256], index: 19, kind: output, shape index: {4}]  }
   0x1   :  { %3405 = sst [smem:[#allocation35_spill]] %s3378_s0 }
   0x2   :  { %3406 = sst [smem:[#allocation36_spill]] %s3379_s1 }
   0x3   :  { %3407 = sst [smem:[#allocation37_spill]] %s3380_s2 }
   0x4   :  { %3408 = sst [smem:[#allocation38_spill]] %s3381_s3 }
   0x5   :  { %3409 = sst [smem:[#allocation39_spill]] %s3397_s19 }
   0x6   :  { %25 = vsyncpa [#allocation3], 0 }
   0x7   :  { %26 = vsyncpa [#allocation6], 0 }
   0x8   :  { %27 = vsyncpa [#allocation9], 0 }
   0x9   :  { %28 = vsyncpa [#allocation12], 0 }
   0xa   :  { %29 = vsyncpa [#allocation15], 0 }
   0xb   :  { %30 = vsyncpa [#allocation18], 0 }
   0xc   :  { %31 = vsyncpa [#allocation4], 0 }
   0xd   :  { %32 = vsyncpa [#allocation21], 0 }
   0xe   :  { %33 = vsyncpa [#allocation24], 0  ;;  %s2808_s0 = smov [#allocation5]   ;;  %s2809_s20 = smov [#allocation8]  }
   0xf   :  { %s50_s30 = sshll.u32 %s2808_s0, 4  ;;  %s70_s21 = sshll.u32 %s2809_s20, 4  ;;  %s51_s30 = int_to_ptr.vmem [resolvable:$true] %s50_s30  ;;  %s71_s21 = int_to_ptr.vmem [resolvable:$true] %s70_s21 }
  0x10   :  { %s3410_s2 = sld [smem:[#allocation36_spill]] }
  0x16   :  { %s2460_s23 = scalar_lea.hbm %s3410_s2, 256 }
  0x17   :  { %p2461_p0 = scmp.ne.s32.totalorder %s3410_s2, %s2460_s23  ;;  %p2464_p1 = scmp.lt.u32.totalorder %s2460_s23, %s3410_s2 }
  0x19   :  { %p2466_p2 = pnand %p2464_p1, %p2461_p0 }
  0x1b   :  { %2469 = shalt.err (!%p2466_p2)
}
  0x1c   :  { %s2470_s27 = scalar_lea.vmem %s51_s30, 256  ;;  %p2475_p4 = scmp.lt.s32.totalorder %s51_s30, %s51_s30 }
  0x1d   :  { %p2471_p3 = scmp.ne.s32.totalorder %s51_s30, %s2470_s27  ;;  %p2476_p5 = scmp.lt.s32.totalorder %s2470_s27, %s2470_s27 }
  0x1f   :  { %p2477_p6 = por %p2476_p5, %p2475_p4 }
  0x21   :  { %p2478_p7 = pnand %p2477_p6, %p2471_p3 }
  0x23   :  { %2481 = shalt.err (!%p2478_p7)
}
  0x24   :  { %53 = dma.hbm_to_vmem [thread:$0]  %s3410_s2, 256, %s51_s30, [#allocation6]  }
  0x25   :  { %s3411_s1 = sld [smem:[#allocation38_spill]] }
  0x2b   :  { %s2482_s22 = scalar_lea.hbm %s3411_s1, 256 }
  0x2c   :  { %p2483_p8 = scmp.ne.s32.totalorder %s3411_s1, %s2482_s22  ;;  %p2486_p9 = scmp.lt.u32.totalorder %s2482_s22, %s3411_s1 }
  0x2e   :  { %p2488_p10 = pnand %p2486_p9, %p2483_p8 }
  0x30   :  { %2491 = shalt.err (!%p2488_p10)
}
  0x31   :  { %s2492_s26 = scalar_lea.vmem %s71_s21, 256  ;;  %p2497_p12 = scmp.lt.s32.totalorder %s71_s21, %s71_s21 }
  0x32   :  { %p2493_p11 = scmp.ne.s32.totalorder %s71_s21, %s2492_s26  ;;  %p2498_p13 = scmp.lt.s32.totalorder %s2492_s26, %s2492_s26 }
  0x34   :  { %p2499_p0 = por %p2498_p13, %p2497_p12 }
  0x36   :  { %p2500_p1 = pnand %p2499_p0, %p2493_p11 }
  0x38   :  { %2503 = shalt.err (!%p2500_p1)
}
  0x39   :  { %73 = dma.hbm_to_vmem [thread:$0]  %s3411_s1, 256, %s71_s21, [#allocation9]  }
  0x3a   :  { %s2810_s27 = smov [#allocation11]   ;;  %s2504_s20 = scalar_lea.hbm %s3384_s6, 16384 }
  0x3b   :  { %s93_s28 = sshll.u32 %s2810_s27, 4  ;;  %p2505_p2 = scmp.ne.s32.totalorder %s3384_s6, %s2504_s20  ;;  %s94_s28 = int_to_ptr.vmem [resolvable:$true] %s93_s28 }
  0x3c   :  { %p2508_p3 = scmp.lt.u32.totalorder %s2504_s20, %s3384_s6 }
  0x3e   :  { %p2510_p4 = pnand %p2508_p3, %p2505_p2 }
  0x40   :  { %2513 = shalt.err (!%p2510_p4)
}
  0x41   :  { %s2514_s3 = scalar_lea.vmem %s94_s28, 16384  ;;  %p2519_p6 = scmp.lt.s32.totalorder %s94_s28, %s94_s28 }
  0x42   :  { %p2515_p5 = scmp.ne.s32.totalorder %s94_s28, %s2514_s3  ;;  %p2520_p7 = scmp.lt.s32.totalorder %s2514_s3, %s2514_s3 }
  0x44   :  { %p2521_p8 = por %p2520_p7, %p2519_p6 }
  0x46   :  { %p2522_p9 = pnand %p2521_p8, %p2515_p5 }
  0x48   :  { %2525 = shalt.err (!%p2522_p9)
}
  0x49   :  { %s2811_s21 = smov 512   ;;  %s3403_s1 = smov 32  }
  0x4a   :  { %99 = dma.hbm_to_vmem [thread:$0]  %s3384_s6, 16384, %s94_s28, [#allocation12], %s2811_s21, %s2811_s21, %s3403_s1  }
  0x4b   :  { %s2813_s2 = smov [#allocation14]   ;;  %s2814_s29 = smov [#allocation2]  }
  0x4c   :  { %s119_s27 = sshll.u32 %s2813_s2, 4  ;;  %s40_s0 = sshll.u32 %s2814_s29, 4  ;;  %s120_s27 = int_to_ptr.vmem [resolvable:$true] %s119_s27  ;;  %s41_s0 = int_to_ptr.vmem [resolvable:$true] %s40_s0 }
  0x4d   :  { %s2526_s24 = scalar_lea.hbm %s3387_s9, 2048 }
  0x4e   :  { %p2527_p10 = scmp.ne.s32.totalorder %s3387_s9, %s2526_s24  ;;  %p2530_p11 = scmp.lt.u32.totalorder %s2526_s24, %s3387_s9 }
  0x50   :  { %p2532_p12 = pnand %p2530_p11, %p2527_p10 }
  0x52   :  { %2535 = shalt.err (!%p2532_p12)
}
  0x53   :  { %s2536_s6 = scalar_lea.vmem %s120_s27, 2048  ;;  %p2541_p0 = scmp.lt.s32.totalorder %s120_s27, %s120_s27 }
  0x54   :  { %p2537_p13 = scmp.ne.s32.totalorder %s120_s27, %s2536_s6  ;;  %p2542_p1 = scmp.lt.s32.totalorder %s2536_s6, %s2536_s6 }
  0x56   :  { %p2543_p2 = por %p2542_p1, %p2541_p0 }
  0x58   :  { %p2544_p3 = pnand %p2543_p2, %p2537_p13 }
  0x5a   :  { %2547 = shalt.err (!%p2544_p3)
}
  0x5b   :  { %s2815_s28 = smov 128   ;;  %s2816_s21 = smov 8  }
  0x5c   :  { %125 = dma.hbm_to_vmem [thread:$0]  %s3387_s9, 2048, %s120_s27, [#allocation15], %s2815_s28, %s2815_s28, %s2816_s21  }
  0x5d   :  { %s3412_s29 = sld [smem:[#allocation35_spill]] }
  0x63   :  { %s2548_s20 = scalar_lea.hbm %s3412_s29, 256 }
  0x64   :  { %p2549_p4 = scmp.ne.s32.totalorder %s3412_s29, %s2548_s20  ;;  %p2552_p5 = scmp.lt.u32.totalorder %s2548_s20, %s3412_s29 }
  0x66   :  { %p2554_p6 = pnand %p2552_p5, %p2549_p4 }
  0x68   :  { %2557 = shalt.err (!%p2554_p6)
}
  0x69   :  { %s2558_s3 = scalar_lea.vmem %s41_s0, 256  ;;  %p2563_p8 = scmp.lt.s32.totalorder %s41_s0, %s41_s0 }
  0x6a   :  { %p2559_p7 = scmp.ne.s32.totalorder %s41_s0, %s2558_s3  ;;  %p2564_p9 = scmp.lt.s32.totalorder %s2558_s3, %s2558_s3 }
  0x6c   :  { %p2565_p10 = por %p2564_p9, %p2563_p8 }
  0x6e   :  { %p2566_p11 = pnand %p2565_p10, %p2559_p7 }
  0x70   :  { %2569 = shalt.err (!%p2566_p11)
}
  0x71   :  { %43 = dma.hbm_to_vmem [thread:$0]  %s3412_s29, 256, %s41_s0, [#allocation3]  }
  0x72   :  { %s2817_s6 = smov [#allocation7]   ;;  %s2818_s30 = smov [#allocation10]  }
  0x73   :  { %s60_s26 = sshll.u32 %s2817_s6, 4  ;;  %s79_s19 = sshll.u32 %s2818_s30, 4  ;;  %s61_s26 = int_to_ptr.vmem [resolvable:$true] %s60_s26  ;;  %s80_s19 = int_to_ptr.vmem [resolvable:$true] %s79_s19 }
  0x74   :  { %s3413_s22 = sld [smem:[#allocation37_spill]] }
  0x7a   :  { %s2570_s24 = scalar_lea.hbm %s3413_s22, 128 }
  0x7b   :  { %p2571_p12 = scmp.ne.s32.totalorder %s3413_s22, %s2570_s24  ;;  %p2574_p13 = scmp.lt.u32.totalorder %s2570_s24, %s3413_s22 }
  0x7d   :  { %p2576_p0 = pnand %p2574_p13, %p2571_p12 }
  0x7f   :  { %2579 = shalt.err (!%p2576_p0)
}
  0x80   :  { %s2580_s0 = scalar_lea.vmem %s61_s26, 128  ;;  %p2585_p2 = scmp.lt.s32.totalorder %s61_s26, %s61_s26 }
  0x81   :  { %p2581_p1 = scmp.ne.s32.totalorder %s61_s26, %s2580_s0  ;;  %p2586_p3 = scmp.lt.s32.totalorder %s2580_s0, %s2580_s0 }
  0x83   :  { %p2587_p4 = por %p2586_p3, %p2585_p2 }
  0x85   :  { %p2588_p5 = pnand %p2587_p4, %p2581_p1 }
  0x87   :  { %2591 = shalt.err (!%p2588_p5)
}
  0x88   :  { %63 = dma.hbm_to_vmem [thread:$0]  %s3413_s22, 128, %s61_s26, [#allocation6]  }
  0x89   :  { %s2592_s30 = scalar_lea.hbm %s3382_s4, 8192 }
  0x8a   :  { %p2593_p6 = scmp.ne.s32.totalorder %s3382_s4, %s2592_s30  ;;  %p2596_p7 = scmp.lt.u32.totalorder %s2592_s30, %s3382_s4 }
  0x8c   :  { %p2598_p8 = pnand %p2596_p7, %p2593_p6 }
  0x8e   :  { %2601 = shalt.err (!%p2598_p8)
}
  0x8f   :  { %s2602_s25 = scalar_lea.vmem %s80_s19, 8192  ;;  %p2607_p10 = scmp.lt.s32.totalorder %s80_s19, %s80_s19 }
  0x90   :  { %p2603_p9 = scmp.ne.s32.totalorder %s80_s19, %s2602_s25  ;;  %p2608_p11 = scmp.lt.s32.totalorder %s2602_s25, %s2602_s25 }
  0x92   :  { %p2609_p12 = por %p2608_p11, %p2607_p10 }
  0x94   :  { %p2610_p13 = pnand %p2609_p12, %p2603_p9 }
  0x96   :  { %2613 = shalt.err (!%p2610_p13)
}
  0x97   :  { %s2819_s26 = smov 256   ;;  %s2820_s22 = smov 16  }
  0x98   :  { %85 = dma.hbm_to_vmem [thread:$0]  %s3382_s4, 8192, %s80_s19, [#allocation9], %s2819_s26, %s2819_s26, %s2820_s22  }
  0x99   :  { %s2821_s0 = smov [#allocation13]   ;;  %s2822_s9 = smov [#allocation16]  }
  0x9a   :  { %s107_s29 = sshll.u32 %s2821_s0, 4  ;;  %s133_s27 = sshll.u32 %s2822_s9, 4  ;;  %s108_s29 = int_to_ptr.vmem [resolvable:$true] %s107_s29  ;;  %s134_s27 = int_to_ptr.vmem [resolvable:$true] %s133_s27 }
  0x9b   :  { %s2614_s1 = scalar_lea.hbm %s3386_s8, 2048 }
  0x9c   :  { %p2615_p0 = scmp.ne.s32.totalorder %s3386_s8, %s2614_s1  ;;  %p2618_p1 = scmp.lt.u32.totalorder %s2614_s1, %s3386_s8 }
  0x9e   :  { %p2620_p2 = pnand %p2618_p1, %p2615_p0 }
  0xa0   :  { %2623 = shalt.err (!%p2620_p2)
}
  0xa1   :  { %s2624_s4 = scalar_lea.vmem %s108_s29, 2048  ;;  %p2629_p4 = scmp.lt.s32.totalorder %s108_s29, %s108_s29 }
  0xa2   :  { %p2625_p3 = scmp.ne.s32.totalorder %s108_s29, %s2624_s4  ;;  %p2630_p5 = scmp.lt.s32.totalorder %s2624_s4, %s2624_s4 }
  0xa4   :  { %p2631_p6 = por %p2630_p5, %p2629_p4 }
  0xa6   :  { %p2632_p7 = pnand %p2631_p6, %p2625_p3 }
  0xa8   :  { %2635 = shalt.err (!%p2632_p7)
}
  0xa9   :  { %113 = dma.hbm_to_vmem [thread:$0]  %s3386_s8, 2048, %s108_s29, [#allocation12], %s2815_s28, %s2815_s28, %s2816_s21  }
  0xaa   :  { %s2636_s9 = scalar_lea.hbm %s3389_s11, 4096 }
  0xab   :  { %p2637_p8 = scmp.ne.s32.totalorder %s3389_s11, %s2636_s9  ;;  %p2640_p9 = scmp.lt.u32.totalorder %s2636_s9, %s3389_s11 }
  0xad   :  { %p2642_p10 = pnand %p2640_p9, %p2637_p8 }
  0xaf   :  { %2645 = shalt.err (!%p2642_p10)
}
  0xb0   :  { %s2646_s20 = scalar_lea.vmem %s134_s27, 4096  ;;  %p2651_p12 = scmp.lt.s32.totalorder %s134_s27, %s134_s27 }
  0xb1   :  { %p2647_p11 = scmp.ne.s32.totalorder %s134_s27, %s2646_s20  ;;  %p2652_p13 = scmp.lt.s32.totalorder %s2646_s20, %s2646_s20 }
  0xb3   :  { %p2653_p0 = por %p2652_p13, %p2651_p12 }
  0xb5   :  { %p2654_p1 = pnand %p2653_p0, %p2647_p11 }
  0xb7   :  { %2657 = shalt.err (!%p2654_p1)
}
  0xb8   :  { %139 = dma.hbm_to_vmem [thread:$0]  %s3389_s11, 4096, %s134_s27, [#allocation15], %s2819_s26, %s2819_s26, %s2820_s22  }
  0xb9   :  { %s2823_s29 = smov [#allocation17]   ;;  %s2658_s19 = scalar_lea.hbm %s3391_s13, 8192 }
  0xba   :  { %s147_s24 = sshll.u32 %s2823_s29, 4  ;;  %p2659_p2 = scmp.ne.s32.totalorder %s3391_s13, %s2658_s19  ;;  %s148_s24 = int_to_ptr.vmem [resolvable:$true] %s147_s24 }
  0xbb   :  { %p2662_p3 = scmp.lt.u32.totalorder %s2658_s19, %s3391_s13 }
  0xbd   :  { %p2664_p4 = pnand %p2662_p3, %p2659_p2 }
  0xbf   :  { %2667 = shalt.err (!%p2664_p4)
}
  0xc0   :  { %s2668_s6 = scalar_lea.vmem %s148_s24, 8192  ;;  %p2673_p6 = scmp.lt.s32.totalorder %s148_s24, %s148_s24 }
  0xc1   :  { %p2669_p5 = scmp.ne.s32.totalorder %s148_s24, %s2668_s6  ;;  %p2674_p7 = scmp.lt.s32.totalorder %s2668_s6, %s2668_s6 }
  0xc3   :  { %p2675_p8 = por %p2674_p7, %p2673_p6 }
  0xc5   :  { %p2676_p9 = pnand %p2675_p8, %p2669_p5 }
  0xc7   :  { %2679 = shalt.err (!%p2676_p9)
}
  0xc8   :  { %153 = dma.hbm_to_vmem [thread:$0]  %s3391_s13, 8192, %s148_s24, [#allocation18], %s2819_s26, %s2819_s26, %s2820_s22  }
  0xc9   :  { %2790 = dma.done.wait [#allocation3], 256  }
  0xca   :  { %2791 = vsyncadd [#allocation3], 4294967040 }
  0xcb   :  { %2792 = dma.done.wait [#allocation6], 384  }
  0xcc   :  { %2793 = vsyncadd [#allocation6], 4294966912 }
  0xcd   :  { %2794 = dma.done.wait [#allocation9], 8448  }
  0xce   :  { %2795 = vsyncadd [#allocation9], 4294958848 }
  0xcf   :  { %2796 = dma.done.wait [#allocation12], 18432  }
  0xd0   :  { %2797 = vsyncadd [#allocation12], 4294948864 }
  0xd1   :  { %2798 = dma.done.wait [#allocation15], 6144  }
  0xd2   :  { %2799 = vsyncadd [#allocation15], 4294961152 }
  0xd3   :  { %2800 = dma.done.wait [#allocation18], 8192  }
  0xd4   :  { %2801 = vsyncadd [#allocation18], 4294959104  ;;  %v189_v0 = vld [vmem:[#allocation10 + $0x8] sm:$0xff]  ;;  %v191_v1 = vld [vmem:[#allocation10 + $0x18] sm:$0xff]  ;;  %s2825_s1 = smov 120   ;;  %s2826_s2 = smov 96  }
  0xd5   :  { %v188_v2 = vld [vmem:[#allocation10] sm:$0xff]  ;;  %v2066_v3 = vpack.c.bf16 %v191_v1, %v189_v0  ;;  %v190_v4 = vld [vmem:[#allocation10 + $0x10] sm:$0xff]  ;;  %v193_v5 = vld [vmem:[#allocation10 + $0x28] sm:$0xff]  ;;  %s2827_s20 = smov 112   ;;  %s2828_s8 = smov 80   ;;  %vm974_vm0 = vcmask 64512  }
  0xd6   :  { %v195_v6 = vld [vmem:[#allocation10 + $0x38] sm:$0xff]  ;;  %v2068_v7 = vpack.c.bf16 %v190_v4, %v188_v2  ;;  %v192_v9 = vld [vmem:[#allocation10 + $0x20] sm:$0xff]  ;;  %v194_v10 = vld [vmem:[#allocation10 + $0x30] sm:$0xff]  ;;  %s2829_s28 = smov 88   ;;  %s2830_s29 = smov 64   ;;  %vm2839_vm1 = vmmov 0  }
  0xd7   :  { %v2070_v8 = vpack.c.bf16 %v195_v6, %v193_v5  ;;  %v197_v11 = vld [vmem:[#allocation10 + $0x48] sm:$0xff]  ;;  %2067 = vmatprep.subr.bf16.mxu0 %v2066_v3  ;;  %v199_v12 = vld [vmem:[#allocation10 + $0x58] sm:$0xff]  ;;  %v2072_v13 = vpack.c.bf16 %v194_v10, %v192_v9  ;;  %v196_v15 = vld [vmem:[#allocation10 + $0x40] sm:$0xff]  ;;  %s2831_s24 = smov 72   ;;  %s2832_s25 = smov 48   ;;  %vm1356_vm2 = vcmask 130048  }
  0xd8   :  { %2069 = vmatpush1.bf16.msra.mxu0 %v2068_v7  ;;  %v2074_v14 = vpack.c.bf16 %v199_v12, %v197_v11  ;;  %v198_v16 = vld [vmem:[#allocation10 + $0x50] sm:$0xff]  ;;  %v201_v17 = vld [vmem:[#allocation10 + $0x68] sm:$0xff]  ;;  %v203_v18 = vld [vmem:[#allocation10 + $0x78] sm:$0xff]  ;;  %s2833_s4 = smov 56   ;;  %s3414_s19 = smov 32   ;;  %vm1358_vm3 = vcmask 195584  }
  0xd9   :  { %2071 = vmatprep.subr.bf16.mxu0 %v2070_v8  ;;  %v2076_v19 = vpack.c.bf16 %v198_v16, %v196_v15  ;;  %v2078_v20 = vpack.c.bf16 %v203_v18, %v201_v17  ;;  %v200_v21 = vld [vmem:[#allocation10 + $0x60] sm:$0xff]  ;;  %v202_v22 = vld [vmem:[#allocation10 + $0x70] sm:$0xff]  ;;  %v205_v23 = vld [vmem:[#allocation10 + $0x88] sm:$0xff]  ;;  %s2834_s23 = smov 40   ;;  %s2835_s3 = smov 24   ;;  %vm1360_vm4 = vcmask 261120  }
  0xda   :  { %v207_v24 = vld [vmem:[#allocation10 + $0x98] sm:$0xff]  ;;  %v2080_v25 = vpack.c.bf16 %v202_v22, %v200_v21  ;;  %v204_v27 = vld [vmem:[#allocation10 + $0x80] sm:$0xff]  ;;  %v206_v28 = vld [vmem:[#allocation10 + $0x90] sm:$0xff]  ;;  %vm1362_vm5 = vcmask 326656   ;;  %vm1364_vm6 = vcmask 392192   ;;  %vm1366_vm7 = vcmask 457728  }
  0xdb   :  { %v2082_v26 = vpack.c.bf16 %v207_v24, %v205_v23  ;;  %v209_v29 = vld [vmem:[#allocation10 + $0xa8] sm:$0xff]  ;;  %v211_v30 = vld [vmem:[#allocation10 + $0xb8] sm:$0xff]  ;;  %v2084_v31 = vpack.c.bf16 %v206_v28, %v204_v27  ;;  %v208_v33 = vld [vmem:[#allocation10 + $0xa0] sm:$0xff]  ;;  %vm1368_vm8 = vcmask 523264   ;;  %vm1370_vm9 = vcmask 588800   ;;  %s2841_s9 = smov [#allocation20]  }
  0xdc   :  { %2073 = vmatpush1.bf16.msra.mxu0 %v2072_v13  ;;  %v2086_v32 = vpack.c.bf16 %v211_v30, %v209_v29  ;;  %v210_v34 = vld [vmem:[#allocation10 + $0xb0] sm:$0xff]  ;;  %v213_v35 = vld [vmem:[#allocation10 + $0xc8] sm:$0xff]  ;;  %v215_v36 = vld [vmem:[#allocation10 + $0xd8] sm:$0xff]  ;;  %vm1372_vm10 = vcmask 654336   ;;  %vm1374_vm11 = vcmask 719872   ;;  %vm1376_vm12 = vcmask 785408  }
  0xdd   :  { %2075 = vmatprep.subr.bf16.mxu0 %v2074_v14  ;;  %v2088_v37 = vpack.c.bf16 %v210_v34, %v208_v33  ;;  %v212_v38 = vld [vmem:[#allocation10 + $0xc0] sm:$0xff]  ;;  %v2090_v39 = vpack.c.bf16 %v215_v36, %v213_v35  ;;  %v214_v40 = vld [vmem:[#allocation10 + $0xd0] sm:$0xff]  ;;  %v217_v41 = vld [vmem:[#allocation10 + $0xe8] sm:$0xff]  ;;  %vm1378_vm13 = vcmask 850944   ;;  %vm1380_vm14 = vcmask 916480   ;;  %s1901_s6 = sshll.u32 %s2841_s9, 4  ;;  %s1902_s6 = int_to_ptr.vmem [resolvable:$true] %s1901_s6 }
  0xde   :  { %v187_v42 = vld [vmem:[#allocation2 + $0x8] sm:$0xff]  ;;  %v219_v43 = vld [vmem:[#allocation10 + $0xf8] sm:$0xff]  ;;  %v338_v44 = vld [vmem:[#allocation11 + $0x8] sm:$0xff]  ;;  %v2092_v49 = vpack.c.bf16 %v214_v40, %v212_v38  ;;  %vm1382_vm15 = vcmask 982016   ;;  %s2842_s11 = smov [#allocation23]   ;;  %s2680_s13 = scalar_lea.vmem %s1902_s6, 128 }
  0xdf   :  { %328 = vmatprep.mubr.f32.mxu0 %v187_v42  ;;  %v342_v45 = vld [vmem:[#allocation11 + $0x28] sm:$0xff]  ;;  %v337_v47 = vld [vmem:[#allocation11] sm:$0xff]  ;;  %v2094_v53 = vpack.c.bf16 %v219_v43, %v217_v41  ;;  %v218_v54 = vld [vmem:[#allocation10 + $0xf0] sm:$0xff]  ;;  %s1921_s27 = sshll.u32 %s2842_s11, 4  ;;  %p2681_p10 = scmp.ne.s32.totalorder %s1902_s6, %s2680_s13  ;;  %s1922_s27 = int_to_ptr.vmem [resolvable:$true] %s1921_s27 }
  0xe0   :  { %2077 = vmatpush1.bf16.msra.mxu0 %v2076_v19  ;;  %v2130_v46 = vpack.c.bf16 %v342_v45, %v338_v44  ;;  %v341_v48 = vld [vmem:[#allocation11 + $0x20] sm:$0xff]  ;;  %v346_v52 = vld [vmem:[#allocation11 + $0x48] sm:$0xff]  ;;  %v223_v57 = vld [vmem:[#allocation10 + $0x118] sm:$0xff]  ;;  %p2685_p11 = scmp.lt.s32.totalorder %s1902_s6, %s1902_s6  ;;  %p2686_p12 = scmp.lt.s32.totalorder %s2680_s13, %s2680_s13 }
  0xe1   :  { %2079 = vmatprep.subr.bf16.mxu0 %v2078_v20  ;;  %v216_v50 = vld [vmem:[#allocation10 + $0xe0] sm:$0xff]  ;;  %v2132_v51 = vpack.c.bf16 %v341_v48, %v337_v47  ;;  %v221_v55 = vld [vmem:[#allocation10 + $0x108] sm:$0xff]  ;;  %v222_v5 = vld [vmem:[#allocation10 + $0x110] sm:$0xff] }
  0xe2   :  { %2131 = vmatprep.subr.bf16.mxu1 %v2130_v46  ;;  %v350_v56 = vld [vmem:[#allocation11 + $0x68] sm:$0xff]  ;;  %v345_v59 = vld [vmem:[#allocation11 + $0x40] sm:$0xff]  ;;  %v2096_v0 = vpack.c.bf16 %v218_v54, %v216_v50  ;;  %v2098_v4 = vpack.c.bf16 %v223_v57, %v221_v55  ;;  %v227_v8 = vld [vmem:[#allocation10 + $0x138] sm:$0xff]  ;;  %p2687_p13 = por %p2686_p12, %p2685_p11 }
  0xe3   :  { %2133 = vmatpush1.bf16.msra.mxu1 %v2132_v51  ;;  %v2134_v58 = vpack.c.bf16 %v350_v56, %v346_v52  ;;  %v349_v60 = vld [vmem:[#allocation11 + $0x60] sm:$0xff]  ;;  %v354_v62 = vld [vmem:[#allocation11 + $0x88] sm:$0xff]  ;;  %v226_v19 = vld [vmem:[#allocation10 + $0x130] sm:$0xff] }
  0xe4   :  { %2081 = vmatpush1.bf16.msra.mxu0 %v2080_v25  ;;  %v2136_v61 = vpack.c.bf16 %v349_v60, %v345_v59  ;;  %v358_v63 = vld [vmem:[#allocation11 + $0xa8] sm:$0xff]  ;;  %v220_v1 = vld [vmem:[#allocation10 + $0x100] sm:$0xff]  ;;  %v231_v22 = vld [vmem:[#allocation10 + $0x158] sm:$0xff]  ;;  %p2688_p0 = pnand %p2687_p13, %p2681_p10 }
  0xe5   :  { %2083 = vmatprep.subr.bf16.mxu0 %v2082_v26  ;;  %2135 = vmatprep.subr.bf16.mxu1 %v2134_v58  ;;  %v2138_v2 = vpack.c.bf16 %v358_v63, %v354_v62  ;;  %v353_v3 = vld [vmem:[#allocation11 + $0x80] sm:$0xff]  ;;  %v225_v6 = vld [vmem:[#allocation10 + $0x128] sm:$0xff]  ;;  %v2100_v15 = vpack.c.bf16 %v222_v5, %v220_v1  ;;  %v235_v34 = vld [vmem:[#allocation10 + $0x178] sm:$0xff] }
  0xe6   :  { %v357_v7 = vld [vmem:[#allocation11 + $0xa0] sm:$0xff]  ;;  %v362_v10 = vld [vmem:[#allocation11 + $0xc8] sm:$0xff]  ;;  %v2102_v17 = vpack.c.bf16 %v227_v8, %v225_v6  ;;  %v234_v44 = vld [vmem:[#allocation10 + $0x170] sm:$0xff] }
  0xe7   :  { %2137 = vmatpush1.bf16.msra.mxu1 %v2136_v61  ;;  %v2140_v9 = vpack.c.bf16 %v357_v7, %v353_v3  ;;  %v366_v11 = vld [vmem:[#allocation11 + $0xe8] sm:$0xff]  ;;  %v361_v13 = vld [vmem:[#allocation11 + $0xc0] sm:$0xff]  ;;  %v239_v46 = vld [vmem:[#allocation10 + $0x198] sm:$0xff] }
  0xe8   :  { %2085 = vmatpush1.bf16.msra.mxu0 %v2084_v31  ;;  %2139 = vmatprep.subr.bf16.mxu1 %v2138_v2  ;;  %v2142_v12 = vpack.c.bf16 %v366_v11, %v362_v10  ;;  %v365_v14 = vld [vmem:[#allocation11 + $0xe0] sm:$0xff]  ;;  %v370_v16 = vld [vmem:[#allocation11 + $0x108] sm:$0xff]  ;;  %v238_v56 = vld [vmem:[#allocation10 + $0x190] sm:$0xff] }
  0xe9   :  { %2087 = vmatprep.subr.bf16.mxu0 %v2086_v32  ;;  %v224_v18 = vld [vmem:[#allocation10 + $0x120] sm:$0xff]  ;;  %v374_v20 = vld [vmem:[#allocation11 + $0x128] sm:$0xff]  ;;  %v2144_v23 = vpack.c.bf16 %v365_v14, %v361_v13  ;;  %v230_v32 = vld [vmem:[#allocation10 + $0x150] sm:$0xff] }
  0xea   :  { %v229_v21 = vld [vmem:[#allocation10 + $0x148] sm:$0xff]  ;;  %v2146_v24 = vpack.c.bf16 %v374_v20, %v370_v16  ;;  %v369_v25 = vld [vmem:[#allocation11 + $0x100] sm:$0xff]  ;;  %v2104_v27 = vpack.c.bf16 %v226_v19, %v224_v18  ;;  %v243_v58 = vld [vmem:[#allocation10 + $0x1b8] sm:$0xff] }
  0xeb   :  { %2141 = vmatpush1.bf16.msra.mxu1 %v2140_v9  ;;  %v373_v26 = vld [vmem:[#allocation11 + $0x120] sm:$0xff]  ;;  %v378_v28 = vld [vmem:[#allocation11 + $0x148] sm:$0xff]  ;;  %v2106_v30 = vpack.c.bf16 %v231_v22, %v229_v21  ;;  %v247_v6 = vld [vmem:[#allocation10 + $0x1d8] sm:$0xff] }
  0xec   :  { %2089 = vmatpush1.bf16.msra.mxu0 %v2088_v37  ;;  %2143 = vmatprep.subr.bf16.mxu1 %v2142_v12  ;;  %v382_v29 = vld [vmem:[#allocation11 + $0x168] sm:$0xff]  ;;  %v228_v31 = vld [vmem:[#allocation10 + $0x140] sm:$0xff]  ;;  %v2148_v35 = vpack.c.bf16 %v373_v26, %v369_v25  ;;  %v246_v16 = vld [vmem:[#allocation10 + $0x1d0] sm:$0xff] }
  0xed   :  { %2091 = vmatprep.subr.bf16.mxu0 %v2090_v39  ;;  %v233_v33 = vld [vmem:[#allocation10 + $0x168] sm:$0xff]  ;;  %v2150_v36 = vpack.c.bf16 %v382_v29, %v378_v28  ;;  %v377_v37 = vld [vmem:[#allocation11 + $0x140] sm:$0xff]  ;;  %v2108_v39 = vpack.c.bf16 %v230_v32, %v228_v31  ;;  %v251_v18 = vld [vmem:[#allocation10 + $0x1f8] sm:$0xff] }
  0xee   :  { %v381_v38 = vld [vmem:[#allocation11 + $0x160] sm:$0xff]  ;;  %v386_v40 = vld [vmem:[#allocation11 + $0x188] sm:$0xff]  ;;  %v2110_v42 = vpack.c.bf16 %v235_v34, %v233_v33  ;;  %v250_v28 = vld [vmem:[#allocation10 + $0x1f0] sm:$0xff] }
  0xef   :  { %2145 = vmatpush1.bf16.msra.mxu1 %v2144_v23  ;;  %v390_v41 = vld [vmem:[#allocation11 + $0x1a8] sm:$0xff]  ;;  %v232_v43 = vld [vmem:[#allocation10 + $0x160] sm:$0xff]  ;;  %v2152_v47 = vpack.c.bf16 %v381_v38, %v377_v37  ;;  %v340_v29 = vld [vmem:[#allocation11 + $0x18] sm:$0xff] }
  0xf0   :  { %2093 = vmatpush1.bf16.msra.mxu0 %v2092_v49  ;;  %2147 = vmatprep.subr.bf16.mxu1 %v2146_v24  ;;  %v237_v45 = vld [vmem:[#allocation10 + $0x188] sm:$0xff]  ;;  %v2154_v48 = vpack.c.bf16 %v390_v41, %v386_v40  ;;  %v385_v49 = vld [vmem:[#allocation11 + $0x180] sm:$0xff]  ;;  %v2112_v51 = vpack.c.bf16 %v234_v44, %v232_v43  ;;  %v343_v40 = vld [vmem:[#allocation11 + $0x30] sm:$0xff] }
  0xf1   :  { %2095 = vmatprep.subr.bf16.mxu0 %v2094_v53  ;;  %v389_v50 = vld [vmem:[#allocation11 + $0x1a0] sm:$0xff]  ;;  %v394_v52 = vld [vmem:[#allocation11 + $0x1c8] sm:$0xff]  ;;  %v2114_v54 = vpack.c.bf16 %v239_v46, %v237_v45  ;;  %v348_v41 = vld [vmem:[#allocation11 + $0x58] sm:$0xff] }
  0xf2   :  { %v398_v53 = vld [vmem:[#allocation11 + $0x1e8] sm:$0xff]  ;;  %v236_v55 = vld [vmem:[#allocation10 + $0x180] sm:$0xff]  ;;  %v2156_v59 = vpack.c.bf16 %v389_v50, %v385_v49 }
  0xf3   :  { %2149 = vmatpush1.bf16.msra.mxu1 %v2148_v35  ;;  %v241_v57 = vld [vmem:[#allocation10 + $0x1a8] sm:$0xff]  ;;  %v2158_v60 = vpack.c.bf16 %v398_v53, %v394_v52  ;;  %v393_v61 = vld [vmem:[#allocation11 + $0x1c0] sm:$0xff]  ;;  %v2116_v63 = vpack.c.bf16 %v238_v56, %v236_v55  ;;  %v347_v52 = vld [vmem:[#allocation11 + $0x50] sm:$0xff] }
  0xf4   :  { %2097 = vmatpush1.bf16.msra.mxu0 %v2096_v0  ;;  %2151 = vmatprep.subr.bf16.mxu1 %v2150_v36  ;;  %v397_v62 = vld [vmem:[#allocation11 + $0x1e0] sm:$0xff]  ;;  %v402_v0 = vld [vmem:[#allocation11 + $0x208] sm:$0xff]  ;;  %v2118_v2 = vpack.c.bf16 %v243_v58, %v241_v57  ;;  %v351_v53 = vld [vmem:[#allocation11 + $0x70] sm:$0xff] }
  0xf5   :  { %2099 = vmatprep.subr.bf16.mxu0 %v2098_v4  ;;  %v406_v1 = vld [vmem:[#allocation11 + $0x228] sm:$0xff]  ;;  %v240_v3 = vld [vmem:[#allocation10 + $0x1a0] sm:$0xff]  ;;  %v242_v4 = vld [vmem:[#allocation10 + $0x1b0] sm:$0xff]  ;;  %v2160_v7 = vpack.c.bf16 %v397_v62, %v393_v61 }
  0xf6   :  { %v245_v5 = vld [vmem:[#allocation10 + $0x1c8] sm:$0xff]  ;;  %v2162_v8 = vpack.c.bf16 %v406_v1, %v402_v0  ;;  %v401_v9 = vld [vmem:[#allocation11 + $0x200] sm:$0xff]  ;;  %v2120_v11 = vpack.c.bf16 %v242_v4, %v240_v3  ;;  %v360_v55 = vld [vmem:[#allocation11 + $0xb8] sm:$0xff] }
  0xf7   :  { %2153 = vmatpush1.bf16.msra.mxu1 %v2152_v47  ;;  %v405_v10 = vld [vmem:[#allocation11 + $0x220] sm:$0xff]  ;;  %v410_v12 = vld [vmem:[#allocation11 + $0x248] sm:$0xff]  ;;  %v2122_v14 = vpack.c.bf16 %v247_v6, %v245_v5  ;;  %v355_v0 = vld [vmem:[#allocation11 + $0x90] sm:$0xff] }
  0xf8   :  { %2101 = vmatpush1.bf16.msra.mxu0 %v2100_v15  ;;  %2155 = vmatprep.subr.bf16.mxu1 %v2154_v48  ;;  %v414_v13 = vld [vmem:[#allocation11 + $0x268] sm:$0xff]  ;;  %v244_v15 = vld [vmem:[#allocation10 + $0x1c0] sm:$0xff]  ;;  %v2164_v19 = vpack.c.bf16 %v405_v10, %v401_v9  ;;  %v359_v1 = vld [vmem:[#allocation11 + $0xb0] sm:$0xff] }
  0xf9   :  { %2103 = vmatprep.subr.bf16.mxu0 %v2102_v17  ;;  %v249_v17 = vld [vmem:[#allocation10 + $0x1e8] sm:$0xff]  ;;  %v2166_v20 = vpack.c.bf16 %v414_v13, %v410_v12  ;;  %v409_v21 = vld [vmem:[#allocation11 + $0x240] sm:$0xff]  ;;  %v2124_v23 = vpack.c.bf16 %v246_v16, %v244_v15  ;;  %v368_v3 = vld [vmem:[#allocation11 + $0xf8] sm:$0xff] }
  0xfa   :  { %v413_v22 = vld [vmem:[#allocation11 + $0x260] sm:$0xff]  ;;  %v418_v24 = vld [vmem:[#allocation11 + $0x288] sm:$0xff]  ;;  %v2126_v26 = vpack.c.bf16 %v251_v18, %v249_v17  ;;  %v363_v12 = vld [vmem:[#allocation11 + $0xd0] sm:$0xff] }
  0xfb   :  { %2157 = vmatpush1.bf16.msra.mxu1 %v2156_v59  ;;  %v422_v25 = vld [vmem:[#allocation11 + $0x2a8] sm:$0xff]  ;;  %v2168_v31 = vpack.c.bf16 %v413_v22, %v409_v21  ;;  %v417_v33 = vld [vmem:[#allocation11 + $0x280] sm:$0xff]  ;;  %v367_v13 = vld [vmem:[#allocation11 + $0xf0] sm:$0xff] }
  0xfc   :  { %2105 = vmatpush1.bf16.msra.mxu0 %v2104_v27  ;;  %2159 = vmatprep.subr.bf16.mxu1 %v2158_v60  ;;  %v248_v27 = vld [vmem:[#allocation10 + $0x1e0] sm:$0xff]  ;;  %v2170_v32 = vpack.c.bf16 %v422_v25, %v418_v24  ;;  %v426_v36 = vld [vmem:[#allocation11 + $0x2c8] sm:$0xff]  ;;  %v2200_v60 = vpack.c.bf16 %v351_v53, %v347_v52  ;;  %v376_v15 = vld [vmem:[#allocation11 + $0x138] sm:$0xff]  ;;  %v2208_v18 = vpack.c.bf16 %v367_v13, %v363_v12 }
  0xfd   :  { %2107 = vmatprep.subr.bf16.mxu0 %v2106_v30  ;;  %v344_v30 = vld [vmem:[#allocation11 + $0x38] sm:$0xff]  ;;  %v421_v34 = vld [vmem:[#allocation11 + $0x2a0] sm:$0xff]  ;;  %v2128_v35 = vpack.c.bf16 %v250_v28, %v248_v27  ;;  %v430_v37 = vld [vmem:[#allocation11 + $0x2e8] sm:$0xff] }
  0xfe   :  { %v2194_v38 = vpack.c.bf16 %v344_v30, %v340_v29  ;;  %v2172_v43 = vpack.c.bf16 %v421_v34, %v417_v33  ;;  %v2174_v44 = vpack.c.bf16 %v430_v37, %v426_v36  ;;  %v425_v45 = vld [vmem:[#allocation11 + $0x2c0] sm:$0xff]  ;;  %v186_v47 = vld [vmem:[#allocation2] sm:$0xff]  ;;  %v375_v21 = vld [vmem:[#allocation11 + $0x130] sm:$0xff] }
  0xff   :  { %2161 = vmatpush1.bf16.msra.mxu1 %v2160_v7  ;;  %v429_v46 = vld [vmem:[#allocation11 + $0x2e0] sm:$0xff]  ;;  %v434_v49 = vld [vmem:[#allocation11 + $0x308] sm:$0xff]  ;;  %v380_v22 = vld [vmem:[#allocation11 + $0x158] sm:$0xff] }
 0x100   :  { %2109 = vmatpush1.bf16.msra.mxu0 %v2108_v39  ;;  %2163 = vmatprep.subr.bf16.mxu1 %v2162_v8  ;;  %v339_v39 = vld [vmem:[#allocation11 + $0x10] sm:$0xff]  ;;  %v438_v50 = vld [vmem:[#allocation11 + $0x328] sm:$0xff]  ;;  %v2176_v56 = vpack.c.bf16 %v429_v46, %v425_v45  ;;  %v433_v58 = vld [vmem:[#allocation11 + $0x300] sm:$0xff]  ;;  %v2204_v8 = vpack.c.bf16 %v359_v1, %v355_v0 }
 0x101   :  { %2111 = vmatprep.subr.bf16.mxu0 %v2110_v42  ;;  %v352_v42 = vld [vmem:[#allocation11 + $0x78] sm:$0xff]  ;;  %v2196_v48 = vpack.c.bf16 %v343_v40, %v339_v39  ;;  %v2178_v57 = vpack.c.bf16 %v438_v50, %v434_v49  ;;  %v437_v59 = vld [vmem:[#allocation11 + $0x320] sm:$0xff]  ;;  %v442_v61 = vld [vmem:[#allocation11 + $0x348] sm:$0xff] }
 0x102   :  { %v446_v62 = vld [vmem:[#allocation11 + $0x368] sm:$0xff]  ;;  %v2180_v4 = vpack.c.bf16 %v437_v59, %v433_v58  ;;  %v441_v6 = vld [vmem:[#allocation11 + $0x340] sm:$0xff]  ;;  %v383_v27 = vld [vmem:[#allocation11 + $0x170] sm:$0xff] }
 0x103   :  { %2165 = vmatpush1.bf16.msra.mxu1 %v2164_v19  ;;  %v2182_v5 = vpack.c.bf16 %v446_v62, %v442_v61  ;;  %v445_v7 = vld [vmem:[#allocation11 + $0x360] sm:$0xff]  ;;  %v450_v9 = vld [vmem:[#allocation11 + $0x388] sm:$0xff]  ;;  %v388_v28 = vld [vmem:[#allocation11 + $0x198] sm:$0xff] }
 0x104   :  { %2113 = vmatpush1.bf16.msra.mxu0 %v2112_v51  ;;  %2167 = vmatprep.subr.bf16.mxu1 %v2166_v20  ;;  %v2198_v51 = vpack.c.bf16 %v352_v42, %v348_v41  ;;  %v454_v10 = vld [vmem:[#allocation11 + $0x3a8] sm:$0xff]  ;;  %v2184_v16 = vpack.c.bf16 %v445_v7, %v441_v6  ;;  %v371_v20 = vld [vmem:[#allocation11 + $0x110] sm:$0xff]  ;;  %v392_v29 = vld [vmem:[#allocation11 + $0x1b8] sm:$0xff] }
 0x105   :  { %2115 = vmatprep.subr.bf16.mxu0 %v2114_v54  ;;  %v356_v54 = vld [vmem:[#allocation11 + $0x98] sm:$0xff]  ;;  %v2186_v17 = vpack.c.bf16 %v454_v10, %v450_v9  ;;  %v2212_v24 = vpack.c.bf16 %v375_v21, %v371_v20  ;;  %v391_v33 = vld [vmem:[#allocation11 + $0x1b0] sm:$0xff] }
 0x106   :  { %v396_v34 = vld [vmem:[#allocation11 + $0x1d8] sm:$0xff]  ;;  %v399_v39 = vld [vmem:[#allocation11 + $0x1f0] sm:$0xff] }
 0x107   :  { %2169 = vmatpush1.bf16.msra.mxu1 %v2168_v31  ;;  %v2218_v31 = vpack.c.bf16 %v392_v29, %v388_v28  ;;  %v404_v40 = vld [vmem:[#allocation11 + $0x218] sm:$0xff]  ;;  %v407_v45 = vld [vmem:[#allocation11 + $0x230] sm:$0xff]  ;;  %v461_v28 = vld [vmem:[#allocation11 + $0x3e0] sm:$0xff] }
 0x108   :  { %2117 = vmatpush1.bf16.msra.mxu0 %v2116_v63  ;;  %2171 = vmatprep.subr.bf16.mxu1 %v2170_v32  ;;  %v2202_v63 = vpack.c.bf16 %v360_v55, %v356_v54  ;;  %v387_v32 = vld [vmem:[#allocation11 + $0x190] sm:$0xff]  ;;  %v408_v41 = vld [vmem:[#allocation11 + $0x238] sm:$0xff] }
 0x109   :  { %2119 = vmatprep.subr.bf16.mxu0 %v2118_v2  ;;  %v364_v2 = vld [vmem:[#allocation11 + $0xd8] sm:$0xff]  ;;  %v2220_v36 = vpack.c.bf16 %v391_v33, %v387_v32  ;;  %v411_v50 = vld [vmem:[#allocation11 + $0x250] sm:$0xff] }
 0x10a   :  { %v412_v46 = vld [vmem:[#allocation11 + $0x258] sm:$0xff]  ;;  %v427_v62 = vld [vmem:[#allocation11 + $0x2d0] sm:$0xff] }
 0x10b   :  { %2173 = vmatpush1.bf16.msra.mxu1 %v2172_v43  ;;  %v2226_v43 = vpack.c.bf16 %v408_v41, %v404_v40  ;;  %v420_v52 = vld [vmem:[#allocation11 + $0x298] sm:$0xff]  ;;  %v443_v10 = vld [vmem:[#allocation11 + $0x350] sm:$0xff] }
 0x10c   :  { %2121 = vmatpush1.bf16.msra.mxu0 %v2120_v11  ;;  %2175 = vmatprep.subr.bf16.mxu1 %v2174_v44  ;;  %v2206_v11 = vpack.c.bf16 %v368_v3, %v364_v2  ;;  %v403_v44 = vld [vmem:[#allocation11 + $0x210] sm:$0xff]  ;;  %v424_v53 = vld [vmem:[#allocation11 + $0x2b8] sm:$0xff] }
 0x10d   :  { %2123 = vmatprep.subr.bf16.mxu0 %v2122_v14  ;;  %v372_v14 = vld [vmem:[#allocation11 + $0x118] sm:$0xff]  ;;  %v2234_v55 = vpack.c.bf16 %v424_v53, %v420_v52  ;;  %v455_v20 = vld [vmem:[#allocation11 + $0x3b0] sm:$0xff] }
 0x10e   :  { %v2210_v19 = vpack.c.bf16 %v376_v15, %v372_v14  ;;  %v428_v58 = vld [vmem:[#allocation11 + $0x2d8] sm:$0xff]  ;;  %v463_v32 = vld [vmem:[#allocation11 + $0x3f0] sm:$0xff] }
 0x10f   :  { %2177 = vmatpush1.bf16.msra.mxu1 %v2176_v56  ;;  %v419_v56 = vld [vmem:[#allocation11 + $0x290] sm:$0xff]  ;;  %v432_v59 = vld [vmem:[#allocation11 + $0x2f8] sm:$0xff] }
 0x110   :  { %2125 = vmatpush1.bf16.msra.mxu0 %v2124_v23  ;;  %2179 = vmatprep.subr.bf16.mxu1 %v2178_v57  ;;  %v384_v23 = vld [vmem:[#allocation11 + $0x178] sm:$0xff]  ;;  %v423_v57 = vld [vmem:[#allocation11 + $0x2b0] sm:$0xff]  ;;  %v2238_v61 = vpack.c.bf16 %v432_v59, %v428_v58 }
 0x111   :  { %2127 = vmatprep.subr.bf16.mxu0 %v2126_v26  ;;  %v2214_v25 = vpack.c.bf16 %v384_v23, %v380_v22  ;;  %v379_v26 = vld [vmem:[#allocation11 + $0x150] sm:$0xff]  ;;  %v436_v0 = vld [vmem:[#allocation11 + $0x318] sm:$0xff]  ;;  %v458_v22 = vld [vmem:[#allocation11 + $0x3c8] sm:$0xff] }
 0x112   :  { %v2216_v30 = vpack.c.bf16 %v383_v27, %v379_v26  ;;  %v440_v1 = vld [vmem:[#allocation11 + $0x338] sm:$0xff]  ;;  %v462_v23 = vld [vmem:[#allocation11 + $0x3e8] sm:$0xff]  ;;  %v457_v27 = vld [vmem:[#allocation11 + $0x3c0] sm:$0xff] }
 0x113   :  { %2181 = vmatpush1.bf16.msra.mxu1 %v2180_v4  ;;  %v2242_v3 = vpack.c.bf16 %v440_v1, %v436_v0  ;;  %v435_v4 = vld [vmem:[#allocation11 + $0x310] sm:$0xff]  ;;  %v444_v6 = vld [vmem:[#allocation11 + $0x358] sm:$0xff] }
 0x114   :  { %2129 = vmatpush1.bf16.msra.mxu0 %v2128_v35  ;;  %2183 = vmatprep.subr.bf16.mxu1 %v2182_v5  ;;  %v400_v35 = vld [vmem:[#allocation11 + $0x1f8] sm:$0xff]  ;;  %v439_v5 = vld [vmem:[#allocation11 + $0x330] sm:$0xff] }
 0x115   :  { %2195 = vmatprep.subr.bf16.mxu0 %v2194_v38  ;;  %v2222_v37 = vpack.c.bf16 %v400_v35, %v396_v34  ;;  %v395_v38 = vld [vmem:[#allocation11 + $0x1d0] sm:$0xff]  ;;  %v448_v7 = vld [vmem:[#allocation11 + $0x378] sm:$0xff]  ;;  %v254_v34 = vlaneseq }
 0x116   :  { %v2224_v42 = vpack.c.bf16 %v399_v39, %v395_v38  ;;  %v2246_v9 = vpack.c.bf16 %v448_v7, %v444_v6  ;;  %v452_v12 = vld [vmem:[#allocation11 + $0x398] sm:$0xff] }
 0x117   :  { %329 = vmatmul.mubr.f32.vlgmr.msra.gmra.mrb[0].mxu0 %v186_v47  ;;  %2185 = vmatpush1.bf16.msra.mxu1 %v2184_v16  ;;  %v416_v47 = vld [vmem:[#allocation11 + $0x278] sm:$0xff]  ;;  %v449_v16 = vld [vmem:[#allocation11 + $0x380] sm:$0xff]  ;;  %v3082_v35 = vshrl.u32 %v254_v34, 7 }
 0x118   :  { %2197 = vmatpush1.bf16.msra.mxu0 %v2196_v48  ;;  %2187 = vmatprep.subr.bf16.mxu1 %v2186_v17  ;;  %v2228_v48 = vpack.c.bf16 %v407_v45, %v403_v44  ;;  %v2230_v49 = vpack.c.bf16 %v416_v47, %v412_v46  ;;  %v456_v13 = vld [vmem:[#allocation11 + $0x3b8] sm:$0xff]  ;;  %v453_v17 = vld [vmem:[#allocation11 + $0x3a0] sm:$0xff] }
 0x119   :  { %2199 = vmatprep.subr.bf16.mxu0 %v2198_v51  ;;  %v415_v51 = vld [vmem:[#allocation11 + $0x270] sm:$0xff]  ;;  %v2250_v15 = vpack.c.bf16 %v456_v13, %v452_v12  ;;  %v464_v26 = vld [vmem:[#allocation11 + $0x3f8] sm:$0xff]  ;;  %v3091_v38 = vsub.s32 1, %v3082_v35  ;;  %v477_v47 = vsub.s32 2, %v3082_v35 }
 0x11a   :  { %v2232_v54 = vpack.c.bf16 %v415_v51, %v411_v50 }
 0x11c   :  { %2201 = vmatpush1.bf16.msra.mxu0 %v2200_v60  ;;  %v2236_v60 = vpack.c.bf16 %v423_v57, %v419_v56 }
 0x11d   :  { %2203 = vmatprep.subr.bf16.mxu0 %v2202_v63  ;;  %v431_v63 = vld [vmem:[#allocation11 + $0x2f0] sm:$0xff] }
 0x11e   :  { %v2240_v2 = vpack.c.bf16 %v431_v63, %v427_v62 }
 0x120   :  { %2205 = vmatpush1.bf16.msra.mxu0 %v2204_v8  ;;  %v2244_v8 = vpack.c.bf16 %v439_v5, %v435_v4 }
 0x121   :  { %2207 = vmatprep.subr.bf16.mxu0 %v2206_v11  ;;  %v447_v11 = vld [vmem:[#allocation11 + $0x370] sm:$0xff] }
 0x122   :  { %v2248_v14 = vpack.c.bf16 %v447_v11, %v443_v10 }
 0x124   :  { %2209 = vmatpush1.bf16.msra.mxu0 %v2208_v18  ;;  %v451_v18 = vld [vmem:[#allocation11 + $0x390] sm:$0xff] }
 0x125   :  { %2211 = vmatprep.subr.bf16.mxu0 %v2210_v19  ;;  %v2188_v19 = vpack.c.bf16 %v453_v17, %v449_v16  ;;  %v2252_v21 = vpack.c.bf16 %v455_v20, %v451_v18 }
 0x127   :  { %2189 = vmatpush1.bf16.msra.mxu1 %v2188_v19 }
 0x128   :  { %2213 = vmatpush1.bf16.msra.mxu0 %v2212_v24  ;;  %v460_v24 = vld [vmem:[#allocation11 + $0x3d8] sm:$0xff] }
 0x129   :  { %2215 = vmatprep.subr.bf16.mxu0 %v2214_v25  ;;  %v2190_v25 = vpack.c.bf16 %v462_v23, %v458_v22  ;;  %v2254_v29 = vpack.c.bf16 %v464_v26, %v460_v24 }
 0x12b   :  { %2191 = vmatprep.subr.bf16.mxu1 %v2190_v25  ;;  %v2836_v25 = vmov 1983009808  }
 0x12c   :  { %2217 = vmatpush1.bf16.msra.mxu0 %v2216_v30  ;;  %v2192_v30 = vpack.c.bf16 %v461_v28, %v457_v27  ;;  %v705_v26 = vunpack.c.l.s4 %v2836_v25 }
 0x12d   :  { %2219 = vmatprep.subr.bf16.mxu0 %v2218_v31  ;;  %v459_v31 = vld [vmem:[#allocation11 + $0x3d0] sm:$0xff] }
 0x12e   :  { %v2256_v33 = vpack.c.bf16 %v463_v32, %v459_v31  ;;  %2193 = vmatpush1.bf16.msra.mxu1 %v2192_v30  ;;  %v2837_v30 = vmov 1934713408  }
 0x12f   :  { %v769_v31 = vunpack.c.l.s4 %v2837_v30 }
 0x130   :  { %2221 = vmatpush1.bf16.msra.mxu0 %v2220_v36  ;;  %v3085_v36 = vsub.s32 0, %v3082_v35 }
 0x131   :  { %2223 = vmatprep.subr.bf16.mxu0 %v2222_v37  ;;  %v252_v37 = vld [vmem:[%s3383_s5] sm:$0x3] }
 0x132   :  { %v257_v39 = vrot.slane %v252_v37, %v3085_v36  ;;  %v261_v40 = vrot.slane %v252_v37, %v3091_v38 }
 0x134   :  { %2225 = vmatpush1.bf16.msra.mxu0 %v2224_v42 }
 0x135   :  { %2227 = vmatprep.subr.bf16.mxu0 %v2226_v43 }
 0x138   :  { %2229 = vmatpush1.bf16.msra.mxu0 %v2228_v48  ;;  %v465_v48 = vld [vmem:[%s3385_s7] sm:$0xf]  ;;  %s2824_s7 = smov 104  }
 0x139   :  { %2231 = vmatprep.subr.bf16.mxu0 %v2230_v49  ;;  %v481_v49 = vsub.s32 3, %v3082_v35  ;;  %v478_v50 = vrot.slane %v465_v48, %v477_v47  ;;  %v470_v62 = vrot.slane %v465_v48, %v3085_v36  ;;  %v474_v63 = vrot.slane %v465_v48, %v3091_v38 }
 0x13b   :  { %v482_v51 = vrot.slane %v465_v48, %v481_v49 }
 0x13c   :  { %2233 = vmatpush1.bf16.msra.mxu0 %v2232_v54 }
 0x13d   :  { %2235 = vmatprep.subr.bf16.mxu0 %v2234_v55 }
 0x140   :  { %2237 = vmatpush1.bf16.msra.mxu0 %v2236_v60 }
 0x141   :  { %2239 = vmatprep.subr.bf16.mxu0 %v2238_v61 }
 0x144   :  { %2241 = vmatpush1.bf16.msra.mxu0 %v2240_v2  ;;  %v637_v2 = vld [vmem:[#allocation8] sm:$0xff] }
 0x145   :  { %2243 = vmatprep.subr.bf16.mxu0 %v2242_v3  ;;  %v638_v3 = vld [vmem:[#allocation8 + $0x8] sm:$0xff] }
 0x148   :  { %2245 = vmatpush1.bf16.msra.mxu0 %v2244_v8 }
 0x149   :  { %2247 = vmatprep.subr.bf16.mxu0 %v2246_v9 }
 0x14c   :  { %2249 = vmatpush1.bf16.msra.mxu0 %v2248_v14 }
 0x14d   :  { %2251 = vmatprep.subr.bf16.mxu0 %v2250_v15 }
 0x150   :  { %2253 = vmatpush1.bf16.msra.mxu0 %v2252_v21 }
 0x151   :  { %2255 = vmatprep.subr.bf16.mxu0 %v2254_v29  ;;  %v706_v29 = vunpack.c.0.s8 %v705_v26 }
 0x153   :  { %v3138_v37 = vsub.s32 %v706_v29, %v3082_v35 }
 0x154   :  { %2257 = vmatpush1.bf16.msra.mxu0 %v2256_v33 }
 0x1ea   :  { %v330_v41 = vpop.f32.mrb[0].mxu0 }
 0x1eb   :  { %v331_v42 = vadd.f32 %v330_v41, %v257_v39  ;;  %v332_v43 = vpop.f32.mrb[1].mxu0 }
 0x1ec   :  { %v333_v44 = vadd.f32 %v332_v43, %v261_v40  ;;  %v770_v40 = vunpack.c.0.s8 %v769_v31 }
 0x1ed   :  { %v335_v46 = vmax.f32 %v331_v42, 0.0 }
 0x1ee   :  { %v336_v45 = vmax.f32 %v333_v44, 0.0 }
 0x1f0   :  { %551 = vmatprep.mubr.f32.mxu1 %v336_v45  ;;  %622 = vmatprep.mubr.f32.mxu0 %v336_v45 }
 0x1f1   :  { %552 = vmatmul.mubr.f32.vlgmr.msra.gmra.mrb[0].mxu1 %v335_v46  ;;  %623 = vmatmul.mubr.f32.vlgmr.msra.gmra.mrb[2].mxu0 %v335_v46 }
 0x2c4   :  { %v553_v52 = vpop.f32.mrb[0].mxu1  ;;  %v624_v53 = vpop.f32.mrb[2].mxu0 }
 0x2c5   :  { %v625_v54 = vadd.f32 %v624_v53, %v478_v50  ;;  %v555_v55 = vpop.f32.mrb[1].mxu1  ;;  %v626_v56 = vpop.f32.mrb[3].mxu0  ;;  %v554_v0 = vadd.f32 %v553_v52, %v470_v62  ;;  %v3146_v50 = vsub.s32 %v770_v40, %v3082_v35 }
 0x2c6   :  { %v627_v57 = vadd.f32 %v626_v56, %v482_v51  ;;  %v556_v1 = vadd.f32 %v555_v55, %v474_v63 }
 0x2c7   :  { %v629_v58 = vmul.f32 0.5, %v625_v54  ;;  %v643_v6 = vmul.f32 %v554_v0, %v554_v0 }
 0x2c8   :  { %v630_v59 = vmul.f32 0.5, %v627_v57  ;;  %v644_v9 = vmul.f32 %v556_v1, %v556_v1 }
 0x2c9   :  { %v631_v60 = vmul.f32 1.442695, %v629_v58 }
 0x2ca   :  { %v633_v61 = vmul.f32 1.442695, %v630_v59 }
 0x2cb   :  { %2440 = vpow2.f32 %v631_v60 }
 0x2cc   :  { %2442 = vpow2.f32 %v633_v61 }
 0x2d5   :  { %v2441_v4 = vpop.eup %2440 }
 0x2d6   :  { %v2443_v5 = vpop.eup %2442  ;;  %v635_v7 = vmul.f32 %v2441_v4, %v2441_v4  ;;  %v639_v8 = vmul.f32 %v2441_v4, %v637_v2 }
 0x2d7   :  { %v636_v10 = vmul.f32 %v2443_v5, %v2443_v5  ;;  %v640_v11 = vmul.f32 %v2443_v5, %v638_v3 }
 0x2d8   :  { %v645_v12 = vadd.f32 %v643_v6, %v635_v7  ;;  %v3102_v13 = vadd.f32 %v639_v8, %v554_v0 }
 0x2d9   :  { %v642_v14 = vadd.f32 %v640_v11, %v556_v1  ;;  %v646_v15 = vadd.f32 %v644_v9, %v636_v10 }
 0x2da   :  { %v647_v16 = vsub.f32 %v645_v12, %v625_v54 }
 0x2db   :  { %v648_v17 = vsub.f32 %v646_v15, %v627_v57  ;;  %v3104_v18 = vmul.f32 %v642_v14, %v642_v14 }
 0x2dc   :  { %v1959_v19 = vadd.f32 -1.0, %v647_v16 }
 0x2dd   :  { %v1960_v20 = vadd.f32 -1.0, %v648_v17  ;;  %663 = vrot.lane.b32.xlu1 %v3104_v18, %s2824_s7  ;;  %657 = vrot.lane.b32.xlu0 %v3104_v18, %s2825_s1 }
 0x2de   :  { %v651_v21 = vmul.f32 0.5, %v1959_v19 }
 0x2df   :  { %v652_v22 = vmul.f32 0.5, %v1960_v20 }
 0x2e0   :  { %653 = vst [vmem:[#allocation23] sm:$0xff] %v651_v21 }
 0x2e1   :  { %654 = vst [vmem:[#allocation23 + $0x8] sm:$0xff] %v652_v22  ;;  %666 = vrot.lane.b32.xlu1 %v3104_v18, %s2826_s2  ;;  %660 = vrot.lane.b32.xlu0 %v3104_v18, %s2827_s20 }
 0x2e5   :  { %672 = vrot.lane.b32.xlu1 %v3104_v18, %s2828_s8  ;;  %669 = vrot.lane.b32.xlu0 %v3104_v18, %s2829_s28 }
 0x2e9   :  { %678 = vrot.lane.b32.xlu1 %v3104_v18, %s2830_s29  ;;  %675 = vrot.lane.b32.xlu0 %v3104_v18, %s2831_s24 }
 0x2ed   :  { %684 = vrot.lane.b32.xlu1 %v3104_v18, %s2832_s25  ;;  %681 = vrot.lane.b32.xlu0 %v3104_v18, %s2833_s4 }
 0x2f1   :  { %690 = vrot.lane.b32.xlu1 %v3104_v18, %s3414_s19  ;;  %687 = vrot.lane.b32.xlu0 %v3104_v18, %s2834_s23 }
 0x2f5   :  { %696 = vrot.lane.b32.xlu1 %v3104_v18, %s2820_s22  ;;  %693 = vrot.lane.b32.xlu0 %v3104_v18, %s2835_s3 }
 0x2f9   :  { %699 = vrot.lane.b32.xlu0 %v3104_v18, %s2816_s21 }
 0x34f   :  { %v664_v23 = vpop.permute.xlu1 %663  ;;  %v658_v24 = vpop.permute.xlu0 %657 }
 0x350   :  { %v718_v39 = vcombine.low %v658_v24, %v664_v23  ;;  %v719_v51 = vcombine.high %v658_v24, %v664_v23 }
 0x352   :  { %v726_v47 = vrot.slane %v718_v39, %v3138_v37  ;;  %v733_v35 = vrot.slane %v719_v51, %v3138_v37 }
 0x353   :  { %v667_v27 = vpop.permute.xlu1 %666  ;;  %v661_v28 = vpop.permute.xlu0 %660 }
 0x354   :  { %v702_v32 = vcombine.low %v3104_v18, %v661_v28  ;;  %v703_v43 = vcombine.high %v3104_v18, %v661_v28 }
 0x356   :  { %v710_v41 = vrot.slane %v702_v32, %v3138_v37  ;;  %v717_v56 = vrot.slane %v703_v43, %v3138_v37 }
 0x357   :  { %v673_v33 = vpop.permute.xlu1 %672  ;;  %v670_v34 = vpop.permute.xlu0 %669 }
 0x358   :  { %v734_v42 = vcombine.low %v667_v27, %v673_v33  ;;  %v735_v44 = vcombine.high %v667_v27, %v673_v33  ;;  %v766_v52 = vcombine.low %v710_v41, %v726_v47  ;;  %v767_v60 = vcombine.high %v710_v41, %v726_v47 }
 0x359   :  { %v782_v3 = vcombine.low %v717_v56, %v733_v35  ;;  %v783_v17 = vcombine.high %v717_v56, %v733_v35 }
 0x35a   :  { %v742_v53 = vrot.slane %v734_v42, %v3138_v37  ;;  %v749_v57 = vrot.slane %v735_v44, %v3138_v37  ;;  %v774_v0 = vrot.slane %v766_v52, %v3146_v50  ;;  %v781_v8 = vrot.slane %v767_v60, %v3146_v50 }
 0x35b   :  { %v3142_v45 = vpop.permute.xlu1 %678  ;;  %v676_v46 = vpop.permute.xlu0 %675  ;;  %v790_v21 = vrot.slane %v782_v3, %v3146_v50  ;;  %v797_v32 = vrot.slane %v783_v17, %v3146_v50 }
 0x35c   :  { %v750_v48 = vcombine.low %v670_v34, %v676_v46  ;;  %v751_v49 = vcombine.high %v670_v34, %v676_v46 }
 0x35e   :  { %v758_v54 = vrot.slane %v750_v48, %v3138_v37  ;;  %v765_v55 = vrot.slane %v751_v49, %v3138_v37 }
 0x35f   :  { %v3153_v58 = vpop.permute.xlu1 %684  ;;  %v682_v59 = vpop.permute.xlu0 %681 }
 0x360   :  { %v798_v61 = vcombine.low %v742_v53, %v758_v54  ;;  %v799_v62 = vcombine.high %v742_v53, %v758_v54  ;;  %v814_v63 = vcombine.low %v749_v57, %v765_v55  ;;  %v815_v9 = vcombine.high %v749_v57, %v765_v55 }
 0x361   :  { %v838_v18 = vcombine.low %v3142_v45, %v3153_v58  ;;  %v839_v33 = vcombine.high %v3142_v45, %v3153_v58 }
 0x362   :  { %v806_v1 = vrot.slane %v798_v61, %v3146_v50  ;;  %v813_v2 = vrot.slane %v799_v62, %v3146_v50  ;;  %v822_v11 = vrot.slane %v814_v63, %v3146_v50  ;;  %v829_v25 = vrot.slane %v815_v9, %v3146_v50 }
 0x363   :  { %v691_v4 = vpop.permute.xlu1 %690  ;;  %v688_v5 = vpop.permute.xlu0 %687  ;;  %v846_v29 = vrot.slane %v838_v18, %v3138_v37  ;;  %v853_v55 = vrot.slane %v839_v33, %v3138_v37 }
 0x364   :  { %v831_v6 = vcombine.high %v774_v0, %v806_v1  ;;  %v830_v7 = vcombine.low %v774_v0, %v806_v1  ;;  %v854_v10 = vcombine.low %v682_v59, %v688_v5  ;;  %v832_v15 = vcombine.low %v781_v8, %v813_v2 }
 0x365   :  { %v833_v16 = vcombine.high %v781_v8, %v813_v2  ;;  %v834_v23 = vcombine.low %v790_v21, %v822_v11  ;;  %v835_v24 = vcombine.high %v790_v21, %v822_v11  ;;  %v855_v34 = vcombine.high %v682_v59, %v688_v5 }
 0x366   :  { %v981_v12 = vsel %vm974_vm0, %v831_v6, 0.0  ;;  %v975_v14 = vsel %vm974_vm0, %v830_v7, 0.0  ;;  %v862_v22 = vrot.slane %v854_v10, %v3138_v37  ;;  %v987_v27 = vsel %vm974_vm0, %v832_v15, 0.0 }
 0x367   :  { %v697_v19 = vpop.permute.xlu1 %696  ;;  %982 = vadd.xlane.f32.xlu0 %v981_v12  ;;  %976 = vadd.xlane.f32.xlu1 %v975_v14  ;;  %v694_v20 = vpop.permute.xlu0 %693  ;;  %v993_v28 = vsel %vm974_vm0, %v833_v16, 0.0  ;;  %v999_v42 = vsel %vm974_vm0, %v834_v23, 0.0  ;;  %v1005_v43 = vsel %vm974_vm0, %v835_v24, 0.0  ;;  %v836_v44 = vcombine.low %v797_v32, %v829_v25 }
 0x368   :  { %v870_v26 = vcombine.low %v691_v4, %v697_v19  ;;  %v871_v30 = vcombine.high %v691_v4, %v697_v19  ;;  %v902_v41 = vcombine.low %v846_v29, %v862_v22  ;;  %v837_v49 = vcombine.high %v797_v32, %v829_v25 }
 0x369   :  { %v869_v45 = vrot.slane %v855_v34, %v3138_v37  ;;  %v903_v52 = vcombine.high %v846_v29, %v862_v22  ;;  %v1011_v58 = vsel %vm974_vm0, %v836_v44, 0.0 }
 0x36a   :  { %v878_v46 = vrot.slane %v870_v26, %v3138_v37  ;;  %v885_v51 = vrot.slane %v871_v30, %v3138_v37  ;;  %v910_v57 = vrot.slane %v902_v41, %v3146_v50  ;;  %v1017_v59 = vsel %vm974_vm0, %v837_v49, 0.0 }
 0x36b   :  { %988 = vadd.xlane.f32.xlu0 %v987_v27  ;;  %994 = vadd.xlane.f32.xlu1 %v993_v28  ;;  %v700_v31 = vpop.permute.xlu0 %699  ;;  %v918_v62 = vcombine.low %v853_v55, %v869_v45  ;;  %v917_v0 = vrot.slane %v903_v52, %v3146_v50  ;;  %v919_v7 = vcombine.high %v853_v55, %v869_v45 }
 0x36c   :  { %v886_v39 = vcombine.low %v694_v20, %v700_v31  ;;  %v887_v40 = vcombine.high %v694_v20, %v700_v31 }
 0x36d   :  { %v926_v8 = vrot.slane %v918_v62, %v3146_v50  ;;  %v933_v15 = vrot.slane %v919_v7, %v3146_v50  ;;  %v1405_v7 = vld [vmem:[#allocation14] sm:$0xff] }
 0x36e   :  { %v894_v47 = vrot.slane %v886_v39, %v3138_v37  ;;  %v901_v48 = vrot.slane %v887_v40, %v3138_v37 }
 0x36f   :  { %1000 = vadd.xlane.f32.xlu0 %v999_v42  ;;  %1006 = vadd.xlane.f32.xlu1 %v1005_v43 }
 0x370   :  { %v934_v53 = vcombine.low %v878_v46, %v894_v47  ;;  %v935_v54 = vcombine.high %v878_v46, %v894_v47  ;;  %v950_v56 = vcombine.low %v885_v51, %v901_v48  ;;  %v951_v1 = vcombine.high %v885_v51, %v901_v48 }
 0x372   :  { %v942_v60 = vrot.slane %v934_v53, %v3146_v50  ;;  %v949_v61 = vrot.slane %v935_v54, %v3146_v50  ;;  %v958_v2 = vrot.slane %v950_v56, %v3146_v50  ;;  %v965_v9 = vrot.slane %v951_v1, %v3146_v50 }
 0x373   :  { %1012 = vadd.xlane.f32.xlu0 %v1011_v58  ;;  %1018 = vadd.xlane.f32.xlu1 %v1017_v59 }
 0x374   :  { %v967_v35 = vcombine.high %v910_v57, %v942_v60  ;;  %v966_v63 = vcombine.low %v910_v57, %v942_v60  ;;  %v969_v5 = vcombine.high %v917_v0, %v949_v61  ;;  %v968_v6 = vcombine.low %v917_v0, %v949_v61 }
 0x375   :  { %v971_v12 = vcombine.high %v926_v8, %v958_v2  ;;  %v970_v14 = vcombine.low %v926_v8, %v958_v2  ;;  %v973_v18 = vcombine.high %v933_v15, %v965_v9  ;;  %v972_v19 = vcombine.low %v933_v15, %v965_v9  ;;  %v1406_v8 = vld [vmem:[#allocation14 + $0x8] sm:$0xff] }
 0x376   :  { %v984_v3 = vsel %vm974_vm0, %v967_v35, 0.0  ;;  %v978_v4 = vsel %vm974_vm0, %v966_v63, 0.0  ;;  %v996_v10 = vsel %vm974_vm0, %v969_v5, 0.0  ;;  %v990_v11 = vsel %vm974_vm0, %v968_v6, 0.0 }
 0x377   :  { %985 = vadd.xlane.f32.xlu1 %v984_v3  ;;  %979 = vadd.xlane.f32.xlu0 %v978_v4  ;;  %v1008_v16 = vsel %vm974_vm0, %v971_v12, 0.0  ;;  %v1002_v17 = vsel %vm974_vm0, %v970_v14, 0.0  ;;  %v1020_v20 = vsel %vm974_vm0, %v973_v18, 0.0  ;;  %v1014_v21 = vsel %vm974_vm0, %v972_v19, 0.0  ;;  %v1407_v19 = vld [vmem:[#allocation14 + $0x10] sm:$0xff] }
 0x378   :  { %v2838_v14 = vmov 0.0|0.0   ;;  %v2259_v18 = vpack.c.bf16 %v1406_v8, %v1405_v7 }
 0x379   :  { %2258 = vmatprep.subr.bf16.mxu1 %v2838_v14 }
 0x37a   :  { %2260 = vmatpush3.bf16.msra.mxu1 %v2259_v18 }
 0x37b   :  { %997 = vadd.xlane.f32.xlu1 %v996_v10  ;;  %991 = vadd.xlane.f32.xlu0 %v990_v11 }
 0x37c   :  { %2261 = vmatprep.subr.bf16.mxu1 %v2838_v14 }
 0x37f   :  { %1009 = vadd.xlane.f32.xlu1 %v1008_v16  ;;  %1003 = vadd.xlane.f32.xlu0 %v1002_v17 }
 0x383   :  { %1021 = vadd.xlane.f32.xlu1 %v1020_v20  ;;  %1015 = vadd.xlane.f32.xlu0 %v1014_v21  ;;  %v1408_v20 = vld [vmem:[#allocation14 + $0x18] sm:$0xff] }
 0x3f4   :  { %v977_v22 = vpop.xlane.xlu1 %976  ;;  %v983_v23 = vpop.xlane.xlu0 %982 }
 0x3f8   :  { %v995_v24 = vpop.xlane.xlu1 %994  ;;  %v989_v25 = vpop.xlane.xlu0 %988 }
 0x3f9   :  { %v1039_v26 = vcombine.low %v983_v23, %v995_v24  ;;  %v1023_v27 = vcombine.low %v977_v22, %v989_v25  ;;  %v1040_v30 = vcombine.high %v983_v23, %v995_v24  ;;  %v1024_v32 = vcombine.high %v977_v22, %v989_v25 }
 0x3fb   :  { %v1047_v31 = vrot.slane %v1039_v26, %v3138_v37  ;;  %v1031_v33 = vrot.slane %v1023_v27, %v3138_v37  ;;  %v1054_v49 = vrot.slane %v1040_v30, %v3138_v37  ;;  %v1038_v51 = vrot.slane %v1024_v32, %v3138_v37 }
 0x3fc   :  { %v1007_v28 = vpop.xlane.xlu1 %1006  ;;  %v1001_v29 = vpop.xlane.xlu0 %1000  ;;  %v2262_v26 = vpack.c.bf16 %v1408_v20, %v1407_v19  ;;  %v1417_v20 = vld [vmem:[#allocation14 + $0x60] sm:$0xff] }
 0x3fd   :  { %v1088_v53 = vcombine.high %v1031_v33, %v1047_v31  ;;  %v1087_v54 = vcombine.low %v1031_v33, %v1047_v31  ;;  %v1103_v63 = vcombine.low %v1038_v51, %v1054_v49  ;;  %v1104_v9 = vcombine.high %v1038_v51, %v1054_v49 }
 0x3fe   :  { %2263 = vmatpush3.bf16.msra.mxu1 %v2262_v26  ;;  %v1419_v26 = vld [vmem:[#allocation14 + $0x70] sm:$0xff] }
 0x3ff   :  { %v1102_v62 = vrot.slane %v1088_v53, %v3146_v50  ;;  %v3220_v35 = vrot.slane %v1087_v54, %v3146_v50  ;;  %v1111_v12 = vrot.slane %v1103_v63, %v3146_v50  ;;  %v1118_v25 = vrot.slane %v1104_v9, %v3146_v50  ;;  %2264 = vmatprep.subr.bf16.mxu1 %v2838_v14  ;;  %v1412_v53 = vld [vmem:[#allocation14 + $0x38] sm:$0xff]  ;;  %v1415_v9 = vld [vmem:[#allocation14 + $0x50] sm:$0xff] }
 0x400   :  { %v1019_v34 = vpop.xlane.xlu1 %1018  ;;  %v1013_v39 = vpop.xlane.xlu0 %1012 }
 0x401   :  { %v1071_v40 = vcombine.low %v1007_v28, %v1019_v34  ;;  %v1072_v41 = vcombine.high %v1007_v28, %v1019_v34  ;;  %v1055_v42 = vcombine.low %v1001_v29, %v1013_v39  ;;  %v1056_v43 = vcombine.high %v1001_v29, %v1013_v39  ;;  %v1409_v34 = vld [vmem:[#allocation14 + $0x20] sm:$0xff]  ;;  %v1410_v39 = vld [vmem:[#allocation14 + $0x28] sm:$0xff] }
 0x402   :  { %v2265_v49 = vpack.c.bf16 %v1410_v39, %v1409_v34 }
 0x403   :  { %v1079_v44 = vrot.slane %v1071_v40, %v3138_v37  ;;  %v1086_v46 = vrot.slane %v1072_v41, %v3138_v37  ;;  %v1063_v47 = vrot.slane %v1055_v42, %v3138_v37  ;;  %v1070_v48 = vrot.slane %v1056_v43, %v3138_v37 }
 0x404   :  { %v3208_v45 = vpop.xlane.xlu1 %985  ;;  %v3210_v52 = vpop.xlane.xlu0 %979  ;;  %2266 = vmatpush3.bf16.msra.mxu1 %v2265_v49 }
 0x405   :  { %v1120_v55 = vcombine.high %v1063_v47, %v1079_v44  ;;  %v1119_v56 = vcombine.low %v1063_v47, %v1079_v44  ;;  %v1135_v57 = vcombine.low %v1070_v48, %v1086_v46  ;;  %v1136_v0 = vcombine.high %v1070_v48, %v1086_v46  ;;  %2267 = vmatprep.subr.bf16.mxu1 %v2838_v14 }
 0x407   :  { %v1134_v58 = vrot.slane %v1120_v55, %v3146_v50  ;;  %v3214_v59 = vrot.slane %v1119_v56, %v3146_v50  ;;  %v1143_v4 = vrot.slane %v1135_v57, %v3146_v50  ;;  %v1150_v17 = vrot.slane %v1136_v0, %v3146_v50 }
 0x408   :  { %v998_v60 = vpop.xlane.xlu1 %997  ;;  %v3216_v61 = vpop.xlane.xlu0 %991 }
 0x409   :  { %v1153_v1 = vcombine.low %v1102_v62, %v1134_v58  ;;  %v1152_v2 = vcombine.high %v3220_v35, %v3214_v59  ;;  %v1151_v3 = vcombine.low %v3220_v35, %v3214_v59  ;;  %v1175_v5 = vcombine.low %v3208_v45, %v998_v60 }
 0x40a   :  { %v1159_v6 = vcombine.low %v3210_v52, %v3216_v61  ;;  %v1154_v15 = vcombine.high %v1102_v62, %v1134_v58  ;;  %v1155_v16 = vcombine.low %v1111_v12, %v1143_v4  ;;  %v1176_v31 = vcombine.high %v3208_v45, %v998_v60 }
 0x40b   :  { %1300 = vrot.lane.b32.xlu1 %v1153_v1, %s2820_s22  ;;  %1296 = vrot.lane.b32.xlu0 %v1152_v2, %s2816_s21  ;;  %v1183_v21 = vrot.slane %v1175_v5, %v3138_v37  ;;  %v1156_v32 = vcombine.high %v1111_v12, %v1143_v4  ;;  %v1157_v33 = vcombine.low %v1118_v25, %v1150_v17  ;;  %v1413_v5 = vld [vmem:[#allocation14 + $0x40] sm:$0xff] }
 0x40c   :  { %v1010_v10 = vpop.xlane.xlu1 %1009  ;;  %v1004_v11 = vpop.xlane.xlu0 %1003  ;;  %v1167_v22 = vrot.slane %v1159_v6, %v3138_v37  ;;  %v1160_v40 = vcombine.high %v3210_v52, %v3216_v61  ;;  %v1190_v51 = vrot.slane %v1176_v31, %v3138_v37  ;;  %v1158_v45 = vcombine.high %v1118_v25, %v1150_v17  ;;  %v1411_v52 = vld [vmem:[#allocation14 + $0x30] sm:$0xff]  ;;  %v1414_v6 = vld [vmem:[#allocation14 + $0x48] sm:$0xff] }
 0x40d   :  { %v2268_v63 = vpack.c.bf16 %v1412_v53, %v1411_v52  ;;  %v2271_v8 = vpack.c.bf16 %v1414_v6, %v1413_v5  ;;  %v1393_v6 = vld [vmem:[#allocation13 + $0x20] sm:$0xff] }
 0x40e   :  { %v1223_v41 = vcombine.low %v1167_v22, %v1183_v21  ;;  %v1174_v54 = vrot.slane %v1160_v40, %v3138_v37  ;;  %v1224_v55 = vcombine.high %v1167_v22, %v1183_v21  ;;  %v1418_v21 = vld [vmem:[#allocation14 + $0x68] sm:$0xff] }
 0x40f   :  { %1304 = vrot.lane.b32.xlu1 %v1154_v15, %s2835_s3  ;;  %1308 = vrot.lane.b32.xlu0 %v1155_v16, %s3414_s19  ;;  %v2840_v15 = vmov 0.0  }
 0x410   :  { %v1022_v23 = vpop.xlane.xlu1 %1021  ;;  %v1016_v24 = vpop.xlane.xlu0 %1015  ;;  %v1231_v56 = vrot.slane %v1223_v41, %v3146_v50  ;;  %v1239_v0 = vcombine.low %v1174_v54, %v1190_v51  ;;  %2269 = vmatpush3.bf16.msra.mxu1 %v2268_v63  ;;  %2028 = vmatprep.mubr.msk.f32.mxu1 %vm2839_vm1, %v2840_v15  ;;  %v1390_v63 = vld [vmem:[#allocation13 + $0x8] sm:$0xff] }
 0x411   :  { %v1207_v27 = vcombine.low %v1010_v10, %v1022_v23  ;;  %v1208_v28 = vcombine.high %v1010_v10, %v1022_v23  ;;  %v1191_v29 = vcombine.low %v1004_v11, %v1016_v24  ;;  %v1192_v30 = vcombine.high %v1004_v11, %v1016_v24  ;;  %2270 = vmatprep.subr.bf16.mxu1 %v2838_v14  ;;  %v1416_v10 = vld [vmem:[#allocation14 + $0x58] sm:$0xff] }
 0x412   :  { %v1240_v11 = vcombine.high %v1174_v54, %v1190_v51  ;;  %v1247_v12 = vrot.slane %v1239_v0, %v3146_v50  ;;  %1679 = vmatprep.mubr.f32.mxu0 %v2840_v15  ;;  %v2274_v18 = vpack.c.bf16 %v1416_v10, %v1415_v9  ;;  %v2277_v24 = vpack.c.bf16 %v1418_v21, %v1417_v20  ;;  %v1395_v9 = vld [vmem:[#allocation13 + $0x30] sm:$0xff]  ;;  %v1396_v10 = vld [vmem:[#allocation13 + $0x38] sm:$0xff]  ;;  %v1402_v20 = vld [vmem:[#allocation13 + $0x68] sm:$0xff] }
 0x413   :  { %v1215_v42 = vrot.slane %v1207_v27, %v3138_v37  ;;  %v1199_v43 = vrot.slane %v1191_v29, %v3138_v37  ;;  %v1222_v44 = vrot.slane %v1208_v28, %v3138_v37  ;;  %v1206_v46 = vrot.slane %v1192_v30, %v3138_v37  ;;  %1312 = vrot.lane.b32.xlu1 %v1156_v32, %s2834_s23  ;;  %v1420_v27 = vld [vmem:[#allocation14 + $0x78] sm:$0xff] }
 0x414   :  { %1316 = vrot.lane.b32.xlu0 %v1157_v33, %s2832_s25  ;;  %v1238_v37 = vrot.slane %v1224_v55, %v3146_v50  ;;  %2272 = vmatpush3.bf16.msra.mxu1 %v2271_v8  ;;  %v1254_v22 = vrot.slane %v1240_v11, %v3146_v50  ;;  %v2280_v28 = vpack.c.bf16 %v1420_v27, %v1419_v26  ;;  %v1397_v11 = vld [vmem:[#allocation13 + $0x40] sm:$0xff]  ;;  %v1572_v26 = vld [vmem:[#allocation16 + $0x8] sm:$0xff]  ;;  %v1574_v27 = vld [vmem:[#allocation16 + $0x18] sm:$0xff] }
 0x415   :  { %v1255_v47 = vcombine.low %v1199_v43, %v1215_v42  ;;  %v1256_v48 = vcombine.high %v1199_v43, %v1215_v42  ;;  %v1271_v58 = vcombine.low %v1206_v46, %v1222_v44  ;;  %v1272_v1 = vcombine.high %v1206_v46, %v1222_v44  ;;  %2273 = vmatprep.subr.bf16.mxu1 %v2838_v14 }
 0x417   :  { %v1263_v57 = vrot.slane %v1255_v47, %v3146_v50  ;;  %1320 = vrot.lane.b32.xlu1 %v1158_v45, %s2833_s4  ;;  %v1270_v62 = vrot.slane %v1256_v48, %v3146_v50  ;;  %v1279_v4 = vrot.slane %v1271_v58, %v3146_v50  ;;  %v1286_v17 = vrot.slane %v1272_v1, %v3146_v50 }
 0x418   :  { %2275 = vmatpush3.bf16.msra.mxu1 %v2274_v18 }
 0x419   :  { %v1288_v60 = vcombine.high %v1231_v56, %v1263_v57  ;;  %v1287_v61 = vcombine.low %v1231_v56, %v1263_v57  ;;  %v1289_v2 = vcombine.low %v1238_v37, %v1270_v62  ;;  %v1290_v7 = vcombine.high %v1238_v37, %v1270_v62  ;;  %2276 = vmatprep.subr.bf16.mxu1 %v2838_v14  ;;  %v1389_v62 = vld [vmem:[#allocation13] sm:$0xff] }
 0x41a   :  { %v1291_v16 = vcombine.low %v1247_v12, %v1279_v4  ;;  %v1292_v19 = vcombine.high %v1247_v12, %v1279_v4  ;;  %v1293_v23 = vcombine.low %v1254_v22, %v1286_v17  ;;  %v1294_v25 = vcombine.high %v1254_v22, %v1286_v17  ;;  %v1392_v4 = vld [vmem:[#allocation13 + $0x18] sm:$0xff]  ;;  %v1398_v12 = vld [vmem:[#allocation13 + $0x48] sm:$0xff]  ;;  %v1403_v22 = vld [vmem:[#allocation13 + $0x70] sm:$0xff] }
 0x41b   :  { %1324 = vrot.lane.b32.xlu0 %v1287_v61, %s2830_s29  ;;  %1328 = vrot.lane.b32.xlu1 %v1288_v60, %s2831_s24  ;;  %v2283_v37 = vpack.c.bf16 %v1390_v63, %v1389_v62  ;;  %v1400_v17 = vld [vmem:[#allocation13 + $0x58] sm:$0xff]  ;;  %v1596_v63 = vld [vmem:[#allocation16 + $0xc8] sm:$0xff] }
 0x41c   :  { %2278 = vmatpush3.bf16.msra.mxu1 %v2277_v24 }
 0x41d   :  { %2279 = vmatprep.subr.bf16.mxu1 %v2838_v14 }
 0x41f   :  { %1332 = vrot.lane.b32.xlu0 %v1289_v2, %s2828_s8  ;;  %1336 = vrot.lane.b32.xlu1 %v1290_v7, %s2829_s28  ;;  %v1391_v2 = vld [vmem:[#allocation13 + $0x10] sm:$0xff]  ;;  %v1394_v7 = vld [vmem:[#allocation13 + $0x28] sm:$0xff] }
 0x420   :  { %2281 = vmatpush3.bf16.msra.mxu1 %v2280_v28  ;;  %v2286_v5 = vpack.c.bf16 %v1392_v4, %v1391_v2  ;;  %v2289_v8 = vpack.c.bf16 %v1394_v7, %v1393_v6  ;;  %v1571_v28 = vld [vmem:[#allocation16] sm:$0xff]  ;;  %v1597_v2 = vld [vmem:[#allocation16 + $0xd0] sm:$0xff]  ;;  %v1602_v6 = vld [vmem:[#allocation16 + $0xf8] sm:$0xff] }
 0x421   :  { %2282 = vmatprep.subr.bf16.mxu1 %v2838_v14 }
 0x423   :  { %1340 = vrot.lane.b32.xlu0 %v1291_v16, %s2826_s2  ;;  %1344 = vrot.lane.b32.xlu1 %v1292_v19, %s2824_s7  ;;  %v2295_v16 = vpack.c.bf16 %v1398_v12, %v1397_v11  ;;  %v1401_v19 = vld [vmem:[#allocation13 + $0x60] sm:$0xff]  ;;  %v1691_v11 = vld [vmem:[#allocation17 + $0x18] sm:$0xff] }
 0x424   :  { %v2301_v21 = vpack.c.bf16 %v1402_v20, %v1401_v19  ;;  %v1688_v12 = vld [vmem:[#allocation17] sm:$0xff] }
 0x427   :  { %1348 = vrot.lane.b32.xlu0 %v1293_v23, %s2827_s20  ;;  %1352 = vrot.lane.b32.xlu1 %v1294_v25, %s2825_s1  ;;  %v1404_v23 = vld [vmem:[#allocation13 + $0x78] sm:$0xff]  ;;  %v1388_v25 = vld [vmem:[#allocation7] sm:$0xff] }
 0x428   :  { %v2304_v24 = vpack.c.bf16 %v1404_v23, %v1403_v22  ;;  %v1694_v22 = vld [vmem:[#allocation17 + $0x30] sm:$0xff]  ;;  %v1697_v23 = vld [vmem:[#allocation17 + $0x48] sm:$0xff] }
 0x47d   :  { %v1301_v50 = vpop.permute.xlu1 %1300  ;;  %v1297_v29 = vpop.permute.xlu0 %1296 }
 0x47e   :  { %v1355_v30 = vsel %vm974_vm0, %v1151_v3, %v1297_v29  ;;  %v1573_v29 = vld [vmem:[#allocation16 + $0x10] sm:$0xff] }
 0x47f   :  { %v1357_v33 = vsel %vm1356_vm2, %v1355_v30, %v1301_v50  ;;  %v2306_v50 = vpack.c.bf16 %v1574_v27, %v1572_v26  ;;  %v1576_v30 = vld [vmem:[#allocation16 + $0x28] sm:$0xff]  ;;  %v1696_v27 = vld [vmem:[#allocation17 + $0x40] sm:$0xff] }
 0x481   :  { %v1305_v31 = vpop.permute.xlu1 %1304  ;;  %v1309_v32 = vpop.permute.xlu0 %1308  ;;  %2307 = vmatprep.subr.bf16.mxu0 %v2306_v50  ;;  %v1701_v50 = vld [vmem:[#allocation17 + $0x68] sm:$0xff] }
 0x482   :  { %v1359_v34 = vsel %vm1358_vm3, %v1357_v33, %v1305_v31  ;;  %v1578_v31 = vld [vmem:[#allocation16 + $0x38] sm:$0xff] }
 0x483   :  { %v1361_v40 = vsel %vm1360_vm4, %v1359_v34, %v1309_v32  ;;  %v2308_v32 = vpack.c.bf16 %v1573_v29, %v1571_v28  ;;  %v2310_v33 = vpack.c.bf16 %v1578_v31, %v1576_v30  ;;  %v1575_v34 = vld [vmem:[#allocation16 + $0x20] sm:$0xff]  ;;  %v1698_v28 = vld [vmem:[#allocation17 + $0x50] sm:$0xff]  ;;  %v1703_v29 = vld [vmem:[#allocation17 + $0x78] sm:$0xff] }
 0x484   :  { %v2348_v30 = vpack.c.bf16 %v1698_v28, %v1696_v27  ;;  %v2350_v31 = vpack.c.bf16 %v1703_v29, %v1701_v50  ;;  %v1741_v27 = vld [vmem:[#allocation17 + $0x1a8] sm:$0xff]  ;;  %v1743_v28 = vld [vmem:[#allocation17 + $0x1b8] sm:$0xff] }
 0x485   :  { %v1313_v39 = vpop.permute.xlu1 %1312  ;;  %2309 = vmatpush1.bf16.msra.mxu0 %v2308_v32  ;;  %v1700_v32 = vld [vmem:[#allocation17 + $0x60] sm:$0xff]  ;;  %v2390_v29 = vpack.c.bf16 %v1743_v28, %v1741_v27 }
 0x486   :  { %v1363_v41 = vsel %vm1362_vm5, %v1361_v40, %v1313_v39  ;;  %v1317_v42 = vpop.permute.xlu0 %1316  ;;  %v1577_v39 = vld [vmem:[#allocation16 + $0x30] sm:$0xff]  ;;  %v1580_v40 = vld [vmem:[#allocation16 + $0x48] sm:$0xff]  ;;  %2311 = vmatprep.subr.bf16.mxu0 %v2310_v33 }
 0x487   :  { %v1365_v44 = vsel %vm1364_vm6, %v1363_v41, %v1317_v42  ;;  %v1582_v41 = vld [vmem:[#allocation16 + $0x58] sm:$0xff]  ;;  %v2312_v42 = vpack.c.bf16 %v1577_v39, %v1575_v34  ;;  %v1702_v33 = vld [vmem:[#allocation17 + $0x70] sm:$0xff]  ;;  %v1705_v34 = vld [vmem:[#allocation17 + $0x88] sm:$0xff] }
 0x488   :  { %v1707_v39 = vld [vmem:[#allocation17 + $0x98] sm:$0xff] }
 0x489   :  { %v1321_v43 = vpop.permute.xlu1 %1320  ;;  %2313 = vmatpush1.bf16.msra.mxu0 %v2312_v42  ;;  %v1704_v42 = vld [vmem:[#allocation17 + $0x80] sm:$0xff] }
 0x48a   :  { %v1367_v59 = vsel %vm1366_vm7, %v1365_v44, %v1321_v43  ;;  %v1579_v43 = vld [vmem:[#allocation16 + $0x40] sm:$0xff]  ;;  %v1581_v44 = vld [vmem:[#allocation16 + $0x50] sm:$0xff] }
 0x48d   :  { %v1325_v35 = vpop.permute.xlu0 %1324  ;;  %v1329_v3 = vpop.permute.xlu1 %1328 }
 0x48e   :  { %v1369_v46 = vsel %vm1368_vm8, %v1367_v59, %v1325_v35  ;;  %v1584_v59 = vld [vmem:[#allocation16 + $0x68] sm:$0xff]  ;;  %v1586_v35 = vld [vmem:[#allocation16 + $0x78] sm:$0xff] }
 0x48f   :  { %v1371_v47 = vsel %vm1370_vm9, %v1369_v46, %v1329_v3  ;;  %v2316_v3 = vpack.c.bf16 %v1581_v44, %v1579_v43  ;;  %v2318_v46 = vpack.c.bf16 %v1586_v35, %v1584_v59  ;;  %v1709_v43 = vld [vmem:[#allocation17 + $0xa8] sm:$0xff]  ;;  %v1711_v44 = vld [vmem:[#allocation17 + $0xb8] sm:$0xff] }
 0x490   :  { %v2358_v35 = vpack.c.bf16 %v1711_v44, %v1709_v43 }
 0x491   :  { %v1333_v48 = vpop.permute.xlu0 %1332  ;;  %v1337_v49 = vpop.permute.xlu1 %1336 }
 0x492   :  { %v1373_v51 = vsel %vm1372_vm10, %v1371_v47, %v1333_v48  ;;  %v1583_v47 = vld [vmem:[#allocation16 + $0x60] sm:$0xff]  ;;  %v1585_v48 = vld [vmem:[#allocation16 + $0x70] sm:$0xff] }
 0x493   :  { %v1375_v45 = vsel %vm1374_vm11, %v1373_v51, %v1337_v49  ;;  %v2320_v49 = vpack.c.bf16 %v1585_v48, %v1583_v47  ;;  %v1588_v51 = vld [vmem:[#allocation16 + $0x88] sm:$0xff]  ;;  %v1715_v48 = vld [vmem:[#allocation17 + $0xd8] sm:$0xff] }
 0x494   :  { %v1713_v47 = vld [vmem:[#allocation17 + $0xc8] sm:$0xff] }
 0x495   :  { %v1341_v52 = vpop.permute.xlu0 %1340  ;;  %v1345_v53 = vpop.permute.xlu1 %1344 }
 0x496   :  { %v1377_v54 = vsel %vm1376_vm12, %v1375_v45, %v1341_v52  ;;  %v1590_v45 = vld [vmem:[#allocation16 + $0x98] sm:$0xff] }
 0x497   :  { %v1379_v55 = vsel %vm1378_vm13, %v1377_v54, %v1345_v53  ;;  %v2322_v52 = vpack.c.bf16 %v1590_v45, %v1588_v51  ;;  %v1587_v53 = vld [vmem:[#allocation16 + $0x80] sm:$0xff]  ;;  %v1589_v54 = vld [vmem:[#allocation16 + $0x90] sm:$0xff]  ;;  %v2362_v51 = vpack.c.bf16 %v1715_v48, %v1713_v47  ;;  %v1749_v48 = vld [vmem:[#allocation17 + $0x1e8] sm:$0xff] }
 0x498   :  { %v1712_v45 = vld [vmem:[#allocation17 + $0xc0] sm:$0xff] }
 0x499   :  { %v1349_v56 = vpop.permute.xlu0 %1348  ;;  %v1353_v57 = vpop.permute.xlu1 %1352 }
 0x49a   :  { %v1381_v58 = vsel %vm1380_vm14, %v1379_v55, %v1349_v56  ;;  %v2324_v55 = vpack.c.bf16 %v1589_v54, %v1587_v53  ;;  %v1592_v56 = vld [vmem:[#allocation16 + $0xa8] sm:$0xff]  ;;  %v1719_v54 = vld [vmem:[#allocation17 + $0xf8] sm:$0xff] }
 0x49b   :  { %v1383_v60 = vsel %vm1382_vm15, %v1381_v58, %v1353_v57  ;;  %v1594_v57 = vld [vmem:[#allocation16 + $0xb8] sm:$0xff]  ;;  %v1717_v53 = vld [vmem:[#allocation17 + $0xe8] sm:$0xff] }
 0x49c   :  { %v1384_v61 = vadd.f32 1e-06, %v1383_v60  ;;  %v2326_v58 = vpack.c.bf16 %v1594_v57, %v1592_v56  ;;  %v1591_v60 = vld [vmem:[#allocation16 + $0xa0] sm:$0xff]  ;;  %v2366_v56 = vpack.c.bf16 %v1719_v54, %v1717_v53  ;;  %v1603_v54 = vld [vmem:[%s3390_s12] sm:$0x3] }
 0x49d   :  { %v1716_v57 = vld [vmem:[#allocation17 + $0xe0] sm:$0xff] }
 0x49e   :  { %2444 = vrsqrt.f32 %v1384_v61  ;;  %v1593_v61 = vld [vmem:[#allocation16 + $0xb0] sm:$0xff] }
 0x49f   :  { %v2328_v62 = vpack.c.bf16 %v1593_v61, %v1591_v60  ;;  %v1721_v60 = vld [vmem:[#allocation17 + $0x108] sm:$0xff]  ;;  %v1723_v61 = vld [vmem:[#allocation17 + $0x118] sm:$0xff] }
 0x4a8   :  { %v2445_v0 = vpop.eup %2444 }
 0x4a9   :  { %v1386_v1 = vmul.f32 %v2445_v0, %v3102_v13  ;;  %v2292_v13 = vpack.c.bf16 %v1396_v10, %v1395_v9  ;;  %v1598_v0 = vld [vmem:[#allocation16 + $0xd8] sm:$0xff]  ;;  %v1601_v9 = vld [vmem:[#allocation16 + $0xf0] sm:$0xff] }
 0x4ab   :  { %2029 = vmatmul.mubr.f32.vlgmr.msra.gmra.mrb[2].mxu1 %v1386_v1  ;;  %1387 = vst [vmem:[#allocation19] sm:$0xff] %v1386_v1  ;;  %v1595_v1 = vld [vmem:[#allocation16 + $0xc0] sm:$0xff] }
 0x4ac   :  { %2284 = vmatpush3.bf16.msra.mxu1 %v2283_v37  ;;  %2063 = vmatprep.mubr.msk.f32.mxu1 %vm2839_vm1, %v2840_v15  ;;  %v1399_v15 = vld [vmem:[#allocation13 + $0x50] sm:$0xff]  ;;  %v2330_v37 = vpack.c.bf16 %v1598_v0, %v1596_v63  ;;  %v2332_v4 = vpack.c.bf16 %v1597_v2, %v1595_v1  ;;  %v2370_v63 = vpack.c.bf16 %v1723_v61, %v1721_v60  ;;  %v1720_v0 = vld [vmem:[#allocation17 + $0x100] sm:$0xff]  ;;  %v1725_v1 = vld [vmem:[#allocation17 + $0x128] sm:$0xff] }
 0x4ad   :  { %2285 = vmatprep.subr.bf16.mxu1 %v2838_v14  ;;  %v2298_v18 = vpack.c.bf16 %v1400_v17, %v1399_v15  ;;  %v1690_v15 = vld [vmem:[#allocation17 + $0x10] sm:$0xff]  ;;  %v1693_v17 = vld [vmem:[#allocation17 + $0x28] sm:$0xff]  ;;  %v1727_v2 = vld [vmem:[#allocation17 + $0x138] sm:$0xff] }
 0x4ae   :  { %v2340_v19 = vpack.c.bf16 %v1690_v15, %v1688_v12  ;;  %v1730_v12 = vld [vmem:[#allocation17 + $0x150] sm:$0xff]  ;;  %v1735_v15 = vld [vmem:[#allocation17 + $0x178] sm:$0xff] }
 0x4b0   :  { %2287 = vmatpush3.bf16.msra.mxu1 %v2286_v5  ;;  %v1600_v5 = vld [vmem:[#allocation16 + $0xe8] sm:$0xff] }
 0x4b1   :  { %2288 = vmatprep.subr.bf16.mxu1 %v2838_v14  ;;  %v2334_v7 = vpack.c.bf16 %v1602_v6, %v1600_v5  ;;  %v2374_v5 = vpack.c.bf16 %v1727_v2, %v1725_v1  ;;  %v1724_v6 = vld [vmem:[#allocation17 + $0x120] sm:$0xff] }
 0x4b4   :  { %2290 = vmatpush3.bf16.msra.mxu1 %v2289_v8  ;;  %v1599_v8 = vld [vmem:[#allocation16 + $0xe0] sm:$0xff] }
 0x4b5   :  { %2291 = vmatprep.subr.bf16.mxu1 %v2838_v14  ;;  %v2336_v10 = vpack.c.bf16 %v1601_v9, %v1599_v8  ;;  %v1729_v8 = vld [vmem:[#allocation17 + $0x148] sm:$0xff]  ;;  %v1731_v9 = vld [vmem:[#allocation17 + $0x158] sm:$0xff] }
 0x4b8   :  { %2293 = vmatpush3.bf16.msra.mxu1 %v2292_v13  ;;  %v1689_v13 = vld [vmem:[#allocation17 + $0x8] sm:$0xff] }
 0x4b9   :  { %2294 = vmatprep.subr.bf16.mxu1 %v2838_v14 }
 0x4bc   :  { %2296 = vmatpush3.bf16.msra.mxu1 %v2295_v16  ;;  %v2338_v16 = vpack.c.bf16 %v1691_v11, %v1689_v13  ;;  %v2378_v13 = vpack.c.bf16 %v1731_v9, %v1729_v8  ;;  %v1728_v11 = vld [vmem:[#allocation17 + $0x140] sm:$0xff] }
 0x4bd   :  { %2297 = vmatprep.subr.bf16.mxu1 %v2838_v14 }
 0x4c0   :  { %2299 = vmatpush3.bf16.msra.mxu1 %v2298_v18  ;;  %v1695_v18 = vld [vmem:[#allocation17 + $0x38] sm:$0xff] }
 0x4c1   :  { %2300 = vmatprep.subr.bf16.mxu1 %v2838_v14  ;;  %v2342_v20 = vpack.c.bf16 %v1695_v18, %v1693_v17  ;;  %v2380_v17 = vpack.c.bf16 %v1730_v12, %v1728_v11 }
 0x4c4   :  { %2302 = vmatpush3.bf16.msra.mxu1 %v2301_v21  ;;  %v1692_v21 = vld [vmem:[#allocation17 + $0x20] sm:$0xff] }
 0x4c5   :  { %2303 = vmatprep.subr.bf16.mxu1 %v2838_v14  ;;  %v2314_v14 = vpack.c.bf16 %v1582_v41, %v1580_v40  ;;  %v2352_v40 = vpack.c.bf16 %v1702_v33, %v1700_v32  ;;  %v2354_v41 = vpack.c.bf16 %v1707_v39, %v1705_v34  ;;  %v1745_v32 = vld [vmem:[#allocation17 + $0x1c8] sm:$0xff]  ;;  %v1747_v33 = vld [vmem:[#allocation17 + $0x1d8] sm:$0xff] }
 0x4c6   :  { %v2394_v39 = vpack.c.bf16 %v1747_v33, %v1745_v32 }
 0x4c7   :  { %2315 = vmatprep.subr.bf16.mxu0 %v2314_v14  ;;  %v1706_v14 = vld [vmem:[#allocation17 + $0x90] sm:$0xff] }
 0x4c8   :  { %2305 = vmatpush3.bf16.msra.mxu1 %v2304_v24  ;;  %2317 = vmatpush1.bf16.msra.mxu0 %v2316_v3  ;;  %v1699_v24 = vld [vmem:[#allocation17 + $0x58] sm:$0xff]  ;;  %v2356_v59 = vpack.c.bf16 %v1706_v14, %v1704_v42  ;;  %v1708_v3 = vld [vmem:[#allocation17 + $0xa0] sm:$0xff]  ;;  %v1961_v14 = vld [vmem:[%s3388_s10] ss:$0 sm:$0xff] }
 0x4c9   :  { %2319 = vmatprep.subr.bf16.mxu0 %v2318_v46  ;;  %2339 = vmatprep.subr.bf16.mxu1 %v2338_v16  ;;  %v2346_v26 = vpack.c.bf16 %v1699_v24, %v1697_v23  ;;  %v1710_v46 = vld [vmem:[#allocation17 + $0xb0] sm:$0xff]  ;;  %v1733_v16 = vld [vmem:[#allocation17 + $0x168] sm:$0xff] }
 0x4ca   :  { %v2382_v18 = vpack.c.bf16 %v1735_v15, %v1733_v16 }
 0x4cb   :  { %2064 = vmatmul.mubr.f32.vlgmr.msra.gmra.mrb[4].mxu1 %v1388_v25  ;;  %v2344_v25 = vpack.c.bf16 %v1694_v22, %v1692_v21  ;;  %v1737_v21 = vld [vmem:[#allocation17 + $0x188] sm:$0xff]  ;;  %v1739_v22 = vld [vmem:[#allocation17 + $0x198] sm:$0xff] }
 0x4cc   :  { %2321 = vmatpush1.bf16.msra.mxu0 %v2320_v49  ;;  %2341 = vmatpush1.bf16.msra.mxu1 %v2340_v19  ;;  %v2360_v49 = vpack.c.bf16 %v1710_v46, %v1708_v3  ;;  %v1732_v19 = vld [vmem:[#allocation17 + $0x160] sm:$0xff]  ;;  %v2386_v24 = vpack.c.bf16 %v1739_v22, %v1737_v21  ;;  %v1746_v46 = vld [vmem:[#allocation17 + $0x1d0] sm:$0xff] }
 0x4cd   :  { %2323 = vmatprep.subr.bf16.mxu0 %v2322_v52  ;;  %2343 = vmatprep.subr.bf16.mxu1 %v2342_v20  ;;  %v1714_v52 = vld [vmem:[#allocation17 + $0xd0] sm:$0xff]  ;;  %v1744_v3 = vld [vmem:[#allocation17 + $0x1c0] sm:$0xff] }
 0x4ce   :  { %v1734_v20 = vld [vmem:[#allocation17 + $0x170] sm:$0xff]  ;;  %v2396_v47 = vpack.c.bf16 %v1746_v46, %v1744_v3 }
 0x4cf   :  { %v2384_v23 = vpack.c.bf16 %v1734_v20, %v1732_v19 }
 0x4d0   :  { %2325 = vmatpush1.bf16.msra.mxu0 %v2324_v55  ;;  %2345 = vmatpush1.bf16.msra.mxu1 %v2344_v25  ;;  %v2364_v55 = vpack.c.bf16 %v1714_v52, %v1712_v45  ;;  %v1736_v25 = vld [vmem:[#allocation17 + $0x180] sm:$0xff]  ;;  %v1750_v52 = vld [vmem:[#allocation17 + $0x1f0] sm:$0xff] }
 0x4d1   :  { %2327 = vmatprep.subr.bf16.mxu0 %v2326_v58  ;;  %2347 = vmatprep.subr.bf16.mxu1 %v2346_v26  ;;  %v1718_v58 = vld [vmem:[#allocation17 + $0xf0] sm:$0xff] }
 0x4d2   :  { %v1738_v26 = vld [vmem:[#allocation17 + $0x190] sm:$0xff] }
 0x4d3   :  { %v2388_v50 = vpack.c.bf16 %v1738_v26, %v1736_v25 }
 0x4d4   :  { %2329 = vmatpush1.bf16.msra.mxu0 %v2328_v62  ;;  %2349 = vmatpush1.bf16.msra.mxu1 %v2348_v30  ;;  %v2368_v62 = vpack.c.bf16 %v1718_v58, %v1716_v57  ;;  %v1740_v30 = vld [vmem:[#allocation17 + $0x1a0] sm:$0xff] }
 0x4d5   :  { %2331 = vmatprep.subr.bf16.mxu0 %v2330_v37  ;;  %2351 = vmatprep.subr.bf16.mxu1 %v2350_v31  ;;  %v1722_v37 = vld [vmem:[#allocation17 + $0x110] sm:$0xff] }
 0x4d6   :  { %v1742_v31 = vld [vmem:[#allocation17 + $0x1b0] sm:$0xff] }
 0x4d7   :  { %v2392_v34 = vpack.c.bf16 %v1742_v31, %v1740_v30 }
 0x4d8   :  { %2333 = vmatpush1.bf16.msra.mxu0 %v2332_v4  ;;  %2353 = vmatpush1.bf16.msra.mxu1 %v2352_v40  ;;  %v2372_v4 = vpack.c.bf16 %v1722_v37, %v1720_v0 }
 0x4d9   :  { %2335 = vmatprep.subr.bf16.mxu0 %v2334_v7  ;;  %2355 = vmatprep.subr.bf16.mxu1 %v2354_v41  ;;  %v1726_v7 = vld [vmem:[#allocation17 + $0x130] sm:$0xff] }
 0x4dc   :  { %2337 = vmatpush1.bf16.msra.mxu0 %v2336_v10  ;;  %2357 = vmatpush1.bf16.msra.mxu1 %v2356_v59  ;;  %v2376_v10 = vpack.c.bf16 %v1726_v7, %v1724_v6 }
 0x4dd   :  { %2359 = vmatprep.subr.bf16.mxu1 %v2358_v35 }
 0x4e0   :  { %2361 = vmatpush1.bf16.msra.mxu1 %v2360_v49  ;;  %v1751_v49 = vld [vmem:[#allocation17 + $0x1f8] sm:$0xff] }
 0x4e1   :  { %2363 = vmatprep.subr.bf16.mxu1 %v2362_v51  ;;  %v1748_v51 = vld [vmem:[#allocation17 + $0x1e0] sm:$0xff]  ;;  %v2398_v45 = vpack.c.bf16 %v1751_v49, %v1749_v48 }
 0x4e2   :  { %v2400_v53 = vpack.c.bf16 %v1750_v52, %v1748_v51 }
 0x4e4   :  { %2365 = vmatpush1.bf16.msra.mxu1 %v2364_v55  ;;  %v1608_v55 = vrot.slane %v1603_v54, %v3085_v36 }
 0x4e5   :  { %2367 = vmatprep.subr.bf16.mxu1 %v2366_v56  ;;  %v1612_v56 = vrot.slane %v1603_v54, %v3091_v38 }
 0x4e8   :  { %2369 = vmatpush1.bf16.msra.mxu1 %v2368_v62 }
 0x4e9   :  { %2371 = vmatprep.subr.bf16.mxu1 %v2370_v63 }
 0x4ec   :  { %2373 = vmatpush1.bf16.msra.mxu1 %v2372_v4 }
 0x4ed   :  { %2375 = vmatprep.subr.bf16.mxu1 %v2374_v5 }
 0x4f0   :  { %2377 = vmatpush1.bf16.msra.mxu1 %v2376_v10 }
 0x4f1   :  { %2379 = vmatprep.subr.bf16.mxu1 %v2378_v13 }
 0x4f4   :  { %2381 = vmatpush1.bf16.msra.mxu1 %v2380_v17 }
 0x4f5   :  { %2383 = vmatprep.subr.bf16.mxu1 %v2382_v18 }
 0x4f8   :  { %2385 = vmatpush1.bf16.msra.mxu1 %v2384_v23 }
 0x4f9   :  { %2387 = vmatprep.subr.bf16.mxu1 %v2386_v24 }
 0x4fc   :  { %2389 = vmatpush1.bf16.msra.mxu1 %v2388_v50 }
 0x4fd   :  { %2391 = vmatprep.subr.bf16.mxu1 %v2390_v29 }
 0x500   :  { %2393 = vmatpush1.bf16.msra.mxu1 %v2392_v34 }
 0x501   :  { %2395 = vmatprep.subr.bf16.mxu1 %v2394_v39 }
 0x504   :  { %2397 = vmatpush1.bf16.msra.mxu1 %v2396_v47 }
 0x505   :  { %2399 = vmatprep.subr.bf16.mxu1 %v2398_v45 }
 0x508   :  { %2401 = vmatpush1.bf16.msra.mxu1 %v2400_v53 }
 0x57e   :  { %v1487_v40 = vpop.f32.mrb[2].mxu1 }
 0x57f   :  { %v2030_v41 = vpop.f32.mrb[3].mxu1 }
 0x59e   :  { %v1557_v42 = vpop.f32.mrb[4].mxu1 }
 0x59f   :  { %v1558_v43 = vadd.f32 %v1557_v42, %v1487_v40  ;;  %v2065_v44 = vpop.f32.mrb[5].mxu1 }
 0x5a1   :  { %v1568_v59 = vadd.f32 %v1961_v14, %v1558_v43 }
 0x5a3   :  { %2446 = vtanh.f32 %v1568_v59 }
 0x5ad   :  { %v2447_v35 = vpop.eup %2446 }
 0x5ae   :  { %1570 = vst [vmem:[#allocation20] sm:$0xff] %v2447_v35  ;;  %1680 = vmatmul.mubr.f32.vlgmr.msra.gmra.mrb[4].mxu0 %v2447_v35 }
 0x681   :  { %v1681_v57 = vpop.f32.mrb[4].mxu0 }
 0x682   :  { %v1682_v58 = vadd.f32 %v1681_v57, %v1608_v55  ;;  %v1683_v60 = vpop.f32.mrb[5].mxu0 }
 0x683   :  { %v1684_v61 = vadd.f32 %v1683_v60, %v1612_v56 }
 0x684   :  { %v1686_v63 = vmax.f32 %v1682_v58, 0.0 }
 0x685   :  { %v1687_v62 = vmax.f32 %v1684_v61, 0.0 }
 0x687   :  { %1828 = vmatprep.mubr.f32.mxu1 %v1687_v62 }
 0x688   :  { %1829 = vmatmul.mubr.f32.vlgmr.msra.gmra.mrb[6].mxu1 %v1686_v63 }
 0x689   :  { %2691 = shalt.err (!%p2688_p0)
}
 0x68a   :  { %s2692_s5 = scalar_lea.hbm %s3394_s16, 128 }
 0x68b   :  { %p2693_p1 = scmp.ne.s32.totalorder %s3394_s16, %s2692_s5  ;;  %p2696_p2 = scmp.lt.u32.totalorder %s2692_s5, %s3394_s16 }
 0x68d   :  { %p2698_p3 = pnand %p2696_p2, %p2693_p1 }
 0x68f   :  { %2701 = shalt.err (!%p2698_p3)
}
 0x690   :  { %1904 = dma.vmem_to_hbm [thread:$0]  %s1902_s6, 128, %s3394_s16, [#allocation21]  }
 0x691   :  { %s2702_s28 = scalar_lea.vmem %s1922_s27, 256  ;;  %p2707_p5 = scmp.lt.s32.totalorder %s1922_s27, %s1922_s27 }
 0x692   :  { %p2703_p4 = scmp.ne.s32.totalorder %s1922_s27, %s2702_s28  ;;  %p2708_p6 = scmp.lt.s32.totalorder %s2702_s28, %s2702_s28 }
 0x694   :  { %p2709_p7 = por %p2708_p6, %p2707_p5 }
 0x696   :  { %p2710_p8 = pnand %p2709_p7, %p2703_p4 }
 0x698   :  { %2713 = shalt.err (!%p2710_p8)
}
 0x699   :  { %s2714_s25 = scalar_lea.hbm %s3396_s18, 256 }
 0x69a   :  { %p2715_p9 = scmp.ne.s32.totalorder %s3396_s18, %s2714_s25  ;;  %p2718_p10 = scmp.lt.u32.totalorder %s2714_s25, %s3396_s18 }
 0x69c   :  { %p2720_p11 = pnand %p2718_p10, %p2715_p9 }
 0x69e   :  { %2723 = shalt.err (!%p2720_p11)
}
 0x69f   :  { %1924 = dma.vmem_to_hbm [thread:$0]  %s1922_s27, 256, %s3396_s18, [#allocation24]  }
 0x6a0   :  { %s2843_s22 = smov [#allocation19]  }
 0x6a1   :  { %s1891_s10 = sshll.u32 %s2843_s22, 4  ;;  %s1892_s10 = int_to_ptr.vmem [resolvable:$true] %s1891_s10 }
 0x6a2   :  { %s2724_s0 = scalar_lea.vmem %s1892_s10, 128  ;;  %p2729_p13 = scmp.lt.s32.totalorder %s1892_s10, %s1892_s10 }
 0x6a3   :  { %p2725_p12 = scmp.ne.s32.totalorder %s1892_s10, %s2724_s0  ;;  %p2730_p0 = scmp.lt.s32.totalorder %s2724_s0, %s2724_s0 }
 0x6a5   :  { %p2731_p1 = por %p2730_p0, %p2729_p13 }
 0x6a7   :  { %p2732_p2 = pnand %p2731_p1, %p2725_p12 }
 0x6a9   :  { %2735 = shalt.err (!%p2732_p2)
}
 0x6aa   :  { %s2736_s11 = scalar_lea.hbm %s3393_s15, 128 }
 0x6ab   :  { %p2737_p3 = scmp.ne.s32.totalorder %s3393_s15, %s2736_s11  ;;  %p2740_p4 = scmp.lt.u32.totalorder %s2736_s11, %s3393_s15 }
 0x6ad   :  { %p2742_p5 = pnand %p2740_p4, %p2737_p3 }
 0x6af   :  { %2745 = shalt.err (!%p2742_p5)
}
 0x6b0   :  { %1894 = dma.vmem_to_hbm [thread:$0]  %s1892_s10, 128, %s3393_s15, [#allocation4]   ;;  %v1752_v0 = vld [vmem:[%s3392_s14] sm:$0x3]  ;;  %v1836_v19 = vld [vmem:[#allocation5 + $0x8] sm:$0xff] }
 0x6b1   :  { %v1757_v37 = vrot.slane %v1752_v0, %v3085_v36  ;;  %v1761_v1 = vrot.slane %v1752_v0, %v3091_v38  ;;  %v1835_v38 = vld [vmem:[#allocation5] sm:$0xff]  ;;  %s2844_s14 = smov [#allocation22]   ;;  %s2845_s1 = smov [#allocation25]  }
 0x6b2   :  { %s1911_s15 = sshll.u32 %s2844_s14, 4  ;;  %s1931_s2 = sshll.u32 %s2845_s1, 4  ;;  %s1912_s15 = int_to_ptr.vmem [resolvable:$true] %s1911_s15  ;;  %s1932_s2 = int_to_ptr.vmem [resolvable:$true] %s1931_s2 }
 0x6b3   :  { %s2746_s20 = scalar_lea.vmem %s1912_s15, 256  ;;  %p2751_p7 = scmp.lt.s32.totalorder %s1912_s15, %s1912_s15 }
 0x6b4   :  { %p2747_p6 = scmp.ne.s32.totalorder %s1912_s15, %s2746_s20  ;;  %p2752_p8 = scmp.lt.s32.totalorder %s2746_s20, %s2746_s20 }
 0x6b6   :  { %p2753_p9 = por %p2752_p8, %p2751_p7 }
 0x6b8   :  { %p2754_p10 = pnand %p2753_p9, %p2747_p6 }
 0x75b   :  { %v1830_v2 = vpop.f32.mrb[6].mxu1 }
 0x75c   :  { %v1831_v4 = vadd.f32 %v1830_v2, %v1757_v37  ;;  %v1832_v5 = vpop.f32.mrb[7].mxu1 }
 0x75d   :  { %v1833_v6 = vadd.f32 %v1832_v5, %v1761_v1 }
 0x75e   :  { %v1837_v7 = vand.u32 2147483647, %v1831_v4  ;;  %v1857_v20 = vmax.f32 %v1831_v4, 0.0  ;;  %v1859_v21 = vmul.f32 %v1835_v38, %v1831_v4  ;;  %vm1849_vm0 = vcmp.ge.f32.partialorder %v1831_v4, 0.0 }
 0x75f   :  { %v1838_v8 = vand.u32 2147483647, %v1833_v6  ;;  %v1858_v27 = vmax.f32 %v1833_v6, 0.0  ;;  %v1860_v28 = vmul.f32 %v1836_v19, %v1833_v6  ;;  %vm1850_vm1 = vcmp.ge.f32.partialorder %v1833_v6, 0.0 }
 0x760   :  { %v1839_v9 = vsub.f32 0.0, %v1837_v7  ;;  %v1861_v34 = vsub.f32 %v1857_v20, %v1859_v21 }
 0x761   :  { %v1840_v10 = vsub.f32 0.0, %v1838_v8  ;;  %v1862_v44 = vsub.f32 %v1858_v27, %v1860_v28 }
 0x762   :  { %v1841_v13 = vmul.f32 1.442695, %v1839_v9 }
 0x763   :  { %v1843_v11 = vmul.f32 1.442695, %v1840_v10 }
 0x764   :  { %2448 = vpow2.f32 %v1841_v13 }
 0x765   :  { %2450 = vpow2.f32 %v1843_v11 }
 0x76e   :  { %v2449_v12 = vpop.eup %2448 }
 0x76f   :  { %v2451_v16 = vpop.eup %2450  ;;  %v1845_v15 = vadd.f32 1.0, %v2449_v12  ;;  %v1866_v36 = vmul.f32 -0.5, %v2449_v12  ;;  %v1869_v24 = vand.u32 2147483647, %v2449_v12 }
 0x770   :  { %v1846_v17 = vadd.f32 1.0, %v2451_v16  ;;  %v1875_v18 = vmul.f32 -0.5, %v2451_v16  ;;  %v1878_v29 = vand.u32 2147483647, %v2451_v16 }
 0x771   :  { %2452 = vrcp.f32 %v1845_v15  ;;  %v1867_v22 = vadd.f32 1.0, %v1866_v36  ;;  %vm3342_vm2 = vcmp.lt.f32.partialorder %v1869_v24, 0.0004427343 }
 0x772   :  { %2454 = vrcp.f32 %v1846_v17  ;;  %v1876_v25 = vadd.f32 1.0, %v1875_v18  ;;  %vm3348_vm3 = vcmp.lt.f32.partialorder %v1878_v29, 0.0004427343 }
 0x773   :  { %2456 = vlog2.f32 %v1845_v15  ;;  %v1868_v40 = vmul.f32 %v2449_v12, %v1867_v22 }
 0x774   :  { %2458 = vlog2.f32 %v1846_v17  ;;  %v1877_v43 = vmul.f32 %v2451_v16, %v1876_v25 }
 0x77b   :  { %v2453_v23 = vpop.eup %2452 }
 0x77c   :  { %v2455_v26 = vpop.eup %2454  ;;  %v1851_v50 = vmul.f32 %v2453_v23, %v2449_v12 }
 0x77d   :  { %v2457_v30 = vpop.eup %2456  ;;  %v1852_v31 = vmul.f32 %v2455_v26, %v2451_v16 }
 0x77e   :  { %v2459_v32 = vpop.eup %2458  ;;  %v1853_v33 = vsel %vm1849_vm0, %v2453_v23, %v1851_v50  ;;  %v1865_v39 = vmul.f32 0.6931472, %v2457_v30 }
 0x77f   :  { %v1854_v41 = vsel %vm1850_vm1, %v2455_v26, %v1852_v31  ;;  %1855 = vst [vmem:[#allocation22] sm:$0xff] %v1853_v33  ;;  %v1874_v14 = vmul.f32 0.6931472, %v2459_v32 }
 0x780   :  { %1856 = vst [vmem:[#allocation22 + $0x8] sm:$0xff] %v1854_v41  ;;  %v1871_v59 = vsel %vm3342_vm2, %v1868_v40, %v1865_v39 }
 0x781   :  { %2757 = shalt.err (!%p2754_p10)
}
 0x782   :  { %s2758_s29 = scalar_lea.hbm %s3395_s17, 256 }
 0x783   :  { %p2759_p11 = scmp.ne.s32.totalorder %s3395_s17, %s2758_s29  ;;  %p2762_p12 = scmp.lt.u32.totalorder %s2758_s29, %s3395_s17 }
 0x785   :  { %p2764_p13 = pnand %p2762_p12, %p2759_p11 }
 0x787   :  { %2767 = shalt.err (!%p2764_p13)
}
 0x788   :  { %1914 = dma.vmem_to_hbm [thread:$0]  %s1912_s15, 256, %s3395_s17, [#allocation21]   ;;  %v1880_v3 = vsel %vm3348_vm3, %v1877_v43, %v1874_v14  ;;  %v1881_v46 = vadd.f32 %v1871_v59, %v1861_v34 }
 0x789   :  { %v1882_v47 = vadd.f32 %v1880_v3, %v1862_v44  ;;  %s2768_s16 = scalar_lea.vmem %s1932_s2, 256  ;;  %p2773_p1 = scmp.lt.s32.totalorder %s1932_s2, %s1932_s2 }
 0x78a   :  { %1883 = vst [vmem:[#allocation25] sm:$0xff] %v1881_v46  ;;  %p2769_p0 = scmp.ne.s32.totalorder %s1932_s2, %s2768_s16  ;;  %p2774_p2 = scmp.lt.s32.totalorder %s2768_s16, %s2768_s16 }
 0x78b   :  { %1884 = vst [vmem:[#allocation25 + $0x8] sm:$0xff] %v1882_v47 }
 0x78c   :  { %p2775_p3 = por %p2774_p2, %p2773_p1 }
 0x78e   :  { %p2776_p4 = pnand %p2775_p3, %p2769_p0 }
 0x790   :  { %2779 = shalt.err (!%p2776_p4)
}
 0x791   :  { %s3419_s10 = sld [smem:[#allocation39_spill]] }
 0x797   :  { %s2780_s0 = scalar_lea.hbm %s3419_s10, 256 }
 0x798   :  { %p2781_p5 = scmp.ne.s32.totalorder %s3419_s10, %s2780_s0  ;;  %p2784_p6 = scmp.lt.u32.totalorder %s2780_s0, %s3419_s10 }
 0x79a   :  { %p2786_p7 = pnand %p2784_p6, %p2781_p5 }
 0x79c   :  { %2789 = shalt.err (!%p2786_p7)
}
 0x79d   :  { %1934 = dma.vmem_to_hbm [thread:$0]  %s1932_s2, 256, %s3419_s10, [#allocation24]  }
 0x79e   :  { %2802 = dma.done.wait [#allocation4], 128  }
 0x79f   :  { %2803 = vsyncadd [#allocation4], 4294967168 }
 0x7a0   :  { %2804 = dma.done.wait [#allocation21], 384  }
 0x7a1   :  { %2805 = vsyncadd [#allocation21], 4294966912 }
 0x7a2   :  { %2806 = dma.done.wait [#allocation24], 512  }
 0x7a3   :  { %2807 = vsyncadd [#allocation24], 4294966784 }
 0x7a4   :  { %1950 = vsyncpa [#allocation3], 1 }
 0x7a5   :  { %1951 = vsyncpa [#allocation6], 1 }
 0x7a6   :  { %1952 = vsyncpa [#allocation9], 1 }
 0x7a7   :  { %1953 = vsyncpa [#allocation12], 1 }
 0x7a8   :  { %1954 = vsyncpa [#allocation15], 1 }
 0x7a9   :  { %1955 = vsyncpa [#allocation18], 1 }
 0x7aa   :  { %1956 = vsyncpa [#allocation4], 1 }
 0x7ab   :  { %1957 = vsyncpa [#allocation21], 1 }
 0x7ac   :  { %1958 = vsyncpa [#allocation24], 1 }

</bundles_post_ra>
